<compile_context>
chip_gen: v5e
topology: v5e:2x2
jax: 0.10.0
libtpu: 0.0.40
codegen_flags: <defaults>
</compile_context>

<pallas_src>
import jax
import jax.numpy as jnp
from jax.experimental import pallas as pl
from jax.experimental.pallas import tpu as pltpu

PAD = 3  # half-width of the largest spatial-attention conv (7 // 2)


def _make_kernel(C, H, W, outC):
    HW = H * W
    OFF = PAD * W + PAD          # flat offset of pixel (0,0) inside the padded plane
    L = HW + 2 * OFF             # padded flat plane length

    def kernel(x_ref, wfold_ref, col_ref, w1d_ref, weff_ref, out_ref,
               fp_ref, cpad_ref):
        # x_ref:     (1, C, HW)  one batch element; C on sublanes, pixels on lanes
        # wfold_ref: (outC, C)   bf16 folded 1x1 fuse-conv weight (VMEM resident)
        # col_ref:   (1, HW)     int32 pixel column index (VMEM resident)
        # w1d_ref:   (3,)        SMEM, 3-tap Conv1d-over-channels weight
        # weff_ref:  (98,)       SMEM, folded 7x7 spatial-attention weights (2 in-ch)
        # out_ref:   (1, outC, HW)
        # fp_ref:    (2, 1, L)   VMEM scratch: zero-padded flattened pooled planes
        # cpad_ref:  (C+2, 1)    VMEM scratch: zero-padded channel-pool vector

        # Zero the pad borders once; interiors are fully rewritten every grid step.
        @pl.when(pl.program_id(0) == 0)
        def _():
            fp_ref[...] = jnp.zeros(fp_ref.shape, fp_ref.dtype)
            cpad_ref[...] = jnp.zeros(cpad_ref.shape, cpad_ref.dtype)

        xs = x_ref[0]                                    # (C, HW) f32

        # ---- channel attention: avg+max over pixels, 3-tap conv over C, sigmoid
        m = jnp.mean(xs, axis=1, keepdims=True)          # (C, 1) lane reduce
        mx = jnp.max(xs, axis=1, keepdims=True)          # (C, 1)
        cpad_ref[pl.ds(1, C), :] = m + mx
        zc = (w1d_ref[0] * cpad_ref[pl.ds(0, C), :]      # ypre[c-1]
              + w1d_ref[1] * cpad_ref[pl.ds(1, C), :]    # ypre[c]
              + w1d_ref[2] * cpad_ref[pl.ds(2, C), :])   # ypre[c+1]
        yc = jax.nn.sigmoid(zc)                          # (C, 1)

        # ---- spatial attention: mean/max over C, folded 7x7 conv on flat planes
        fp_ref[0, :, pl.ds(OFF, HW)] = jnp.mean(xs, axis=0, keepdims=True)
        fp_ref[1, :, pl.ds(OFF, HW)] = jnp.max(xs, axis=0, keepdims=True)
        col = col_ref[...]                               # (1, HW) int32
        s = jnp.zeros((1, HW), jnp.float32)
        for b in range(7):
            db = b - PAD
            valid = jnp.logical_and(col + db >= 0, col + db < W)
            acc = jnp.zeros((1, HW), jnp.float32)
            for a in range(7):
                start = a * W + b                        # static lane shift
                t0 = fp_ref[0, :, pl.ds(start, HW)]      # (1, HW)
                t1 = fp_ref[1, :, pl.ds(start, HW)]
                acc = (acc
                       + weff_ref[a * 7 + b] * t0
                       + weff_ref[49 + a * 7 + b] * t1)
            s = s + jnp.where(valid, acc, 0.0)           # kill column wrap-around
        ax = jax.nn.sigmoid(s)                           # (1, HW)

        # ---- gates + folded 1x1 fuse conv (bf16 MXU, f32 accum) + residual
        xg = xs * yc                                     # (C, HW) channel-gated x
        y = jnp.dot(wfold_ref[...], xg.astype(jnp.bfloat16),
                    preferred_element_type=jnp.float32)  # (outC, HW)
        out_ref[0] = (xs * (1.0 + ax) + y).astype(out_ref.dtype)

    return kernel


def d3block_pallas(x, w1d, w7, w5, w3, w1, wfuse):
    B, C, H, W = x.shape
    outC = wfuse.shape[0]
    assert outC == C, "residual add requires outchannel == inchannel"
    assert C < 512, "implements the concat branch (inchannel < 512) of d3block"
    # TODO(synk): inchannel >= 512 branch (conv3 on summed gates) not implemented.
    f32 = jnp.float32
    HW = H * W
    OFF = PAD * W + PAD
    L = HW + 2 * OFF

    # Fold the four same-padded spatial-attention convs into one effective 7x7 conv.
    w_eff = (w7.astype(f32)
             + jnp.pad(w5.astype(f32), ((0, 0), (1, 1), (1, 1)))
             + jnp.pad(w3.astype(f32), ((0, 0), (2, 2), (2, 2)))
             + jnp.pad(w1.astype(f32), ((0, 0), (3, 3), (3, 3))))
    weff_flat = w_eff.reshape(-1)                                        # (98,)

    # Fold the 3x-replicated 1x1 fuse conv (yc == yh == yw): (outC, 3C) -> (outC, C).
    wfold = wfuse.astype(f32).reshape(outC, 3, C).sum(axis=1).astype(jnp.bfloat16)

    # Free, contiguous reshape (no HBM transpose): pixels become the lane axis.
    x_flat = x.astype(f32).reshape(B, C, HW)

    # Pixel column index for SAME-padding column masks in the flat 7x7 conv.
    col_idx = (jnp.arange(HW, dtype=jnp.int32) % W).reshape(1, HW)

    kernel = _make_kernel(C, H, W, outC)
    out_flat = pl.pallas_call(
        kernel,
        out_shape=jax.ShapeDtypeStruct((B, outC, HW), f32),
        grid=(B,),
        in_specs=[
            pl.BlockSpec((1, C, HW), lambda b: (b, 0, 0)),               # x tile
            pl.BlockSpec((outC, C), lambda b: (0, 0)),                   # folded fuse weight (resident)
            pl.BlockSpec((1, HW), lambda b: (0, 0)),                     # column index (resident)
            pl.BlockSpec(memory_space=pltpu.MemorySpace.SMEM),           # Conv1d weight (3,)
            pl.BlockSpec(memory_space=pltpu.MemorySpace.SMEM),           # folded 7x7 weights (98,)
        ],
        out_specs=pl.BlockSpec((1, outC, HW), lambda b: (b, 0, 0)),
        scratch_shapes=[
            pltpu.VMEM((2, 1, L), f32),                                  # padded flat pooled planes
            pltpu.VMEM((C + 2, 1), f32),                                 # padded channel-pool vector
        ],
        compiler_params=pltpu.CompilerParams(dimension_semantics=("parallel",)),
    )(x_flat, wfold, col_idx, w1d.astype(f32), weff_flat)

    return out_flat.reshape(B, outC, H, W)                               # free reshape back


def d3block_reference(x, w1d, w7, w5, w3, w1, wfuse):
    # Pure-JAX reference mirroring the PyTorch forward (permute calls are no-ops).
    avg = jnp.mean(x, axis=(2, 3), keepdims=True)
    mx = jnp.max(x, axis=(2, 3), keepdims=True)
    ypre = (avg + mx)[:, :, 0, 0]                            # (B, C)
    ypad = jnp.pad(ypre, ((0, 0), (1, 1)))
    z = w1d[0] * ypad[:, :-2] + w1d[1] * ypad[:, 1:-1] + w1d[2] * ypad[:, 2:]
    yc = jax.nn.sigmoid(z)[:, :, None, None]                 # (B, C, 1, 1)

    avg_c = jnp.mean(x, axis=1, keepdims=True)
    max_c = jnp.max(x, axis=1, keepdims=True)
    y2 = jnp.concatenate([avg_c, max_c], axis=1)             # (B, 2, H, W)

    def conv(inp, w):
        return jax.lax.conv_general_dilated(
            inp, w[None], (1, 1), "SAME",
            dimension_numbers=("NCHW", "OIHW", "NCHW"))

    s = conv(y2, w7) + conv(y2, w5) + conv(y2, w3) + conv(y2, w1)
    ax = jax.nn.sigmoid(s)
    yhw = x * ax

    xc = x * yc
    ycat = jnp.concatenate([xc, xc, xc], axis=1)             # (B, 3C, H, W)
    y = jnp.einsum("oc,bchw->bohw", wfuse, ycat)
    return x + y + yhw


if __name__ == "__main__":
    B, C, H, W = 2, 8, 16, 16
    outC = C  # required for the final residual add (as in the PyTorch module)

    key = jax.random.PRNGKey(0)
    ks = jax.random.split(key, 7)
    x = jax.random.normal(ks[0], (B, C, H, W), jnp.float32)
    w1d = jax.random.normal(ks[1], (3,), jnp.float32) * 0.5          # Conv1d(1,1,3) weight
    w7 = jax.random.normal(ks[2], (2, 7, 7), jnp.float32) * 0.1      # Conv2d(2,1,7) weight
    w5 = jax.random.normal(ks[3], (2, 5, 5), jnp.float32) * 0.1      # Conv2d(2,1,5) weight
    w3 = jax.random.normal(ks[4], (2, 3, 3), jnp.float32) * 0.2      # Conv2d(2,1,3) weight
    w1 = jax.random.normal(ks[5], (2, 1, 1), jnp.float32) * 0.5      # Conv2d(2,1,1) weight
    wfuse = (jax.random.normal(ks[6], (outC, 3 * C), jnp.float32)
             * (1.0 / jnp.sqrt(3.0 * C)))                            # Conv2d(3C,outC,1) weight

    out = jax.jit(d3block_pallas)(x, w1d, w7, w5, w3, w1, wfuse)
    out = jax.block_until_ready(out)

    ref = d3block_reference(x, w1d, w7, w5, w3, w1, wfuse)
    assert out.shape == (B, outC, H, W)
    max_err = float(jnp.max(jnp.abs(out - ref)))
    assert jnp.allclose(out, ref, atol=5e-2, rtol=5e-2), f"max abs err = {max_err}"
    print("KERNEL_OK")
</pallas_src>

<mosaic_0001>
module attributes {stable_mosaic.version = 11 : i64} {
  func.func @kernel(%arg0: i32, %arg1: memref<1x8x256xf32, #tpu.memory_space<vmem>>, %arg2: memref<8x8xbf16, #tpu.memory_space<vmem>>, %arg3: memref<1x256xi32, #tpu.memory_space<vmem>>, %arg4: memref<3xf32, #tpu.memory_space<smem>>, %arg5: memref<98xf32, #tpu.memory_space<smem>>, %arg6: memref<1x8x256xf32, #tpu.memory_space<vmem>>, %arg7: memref<2x1x358xf32, #tpu.memory_space<vmem>>, %arg8: memref<10x1xf32, #tpu.memory_space<vmem>>) attributes {dimension_semantics = [#tpu.dimension_semantics<parallel>], iteration_bounds = array<i64: 2>, scalar_prefetch = 0 : i64, scratch_operands = 2 : i64, tpu.core_type = #tpu.core_type<tc>, window_params = [{transform_indices = @transform_0, window_bounds = array<i64: 1, 8, 256>}, {pipeline_mode = #tpu.pipeline_mode<synchronous>, transform_indices = @transform_1, window_bounds = array<i64: 8, 8>}, {pipeline_mode = #tpu.pipeline_mode<synchronous>, transform_indices = @transform_2, window_bounds = array<i64: 1, 256>}, {transform_indices = @transform_3, window_bounds = array<i64: 3>}, {transform_indices = @transform_4, window_bounds = array<i64: 98>}, {transform_indices = @transform_5, window_bounds = array<i64: 1, 8, 256>}]} {
    %c0_i32 = arith.constant 0 : i32
    %0 = arith.cmpi eq, %arg0, %c0_i32 : i32
    %1 = arith.extui %0 : i1 to i32
    %c0_i32_0 = arith.constant 0 : i32
    %2 = arith.cmpi ne, %1, %c0_i32_0 : i32
    scf.if %2 {
      %cst_362 = arith.constant 0.000000e+00 : f32
      %743 = vector.broadcast %cst_362 : f32 to vector<2x1x358xf32>
      %c0_363 = arith.constant 0 : index
      %c0_364 = arith.constant 0 : index
      %c0_365 = arith.constant 0 : index
      %744 = vector.load %arg7[%c0_363, %c0_364, %c0_365] : memref<2x1x358xf32, #tpu.memory_space<vmem>>, vector<2x1x358xf32>
      tpu.vector_store %arg7[%c0_363, %c0_364, %c0_365], %743 {strides = array<i32>} : memref<2x1x358xf32, #tpu.memory_space<vmem>>, vector<2x1x358xf32>,
      %cst_366 = arith.constant 0.000000e+00 : f32
      %745 = vector.broadcast %cst_366 : f32 to vector<10x1xf32>
      %c0_367 = arith.constant 0 : index
      %c0_368 = arith.constant 0 : index
      %746 = vector.load %arg8[%c0_367, %c0_368] : memref<10x1xf32, #tpu.memory_space<vmem>>, vector<10x1xf32>
      tpu.vector_store %arg8[%c0_367, %c0_368], %745 {strides = array<i32>} : memref<10x1xf32, #tpu.memory_space<vmem>>, vector<10x1xf32>,
    } else {
    }
    %c0 = arith.constant 0 : index
    %c0_1 = arith.constant 0 : index
    %c0_2 = arith.constant 0 : index
    %3 = vector.load %arg1[%c0, %c0_1, %c0_2] : memref<1x8x256xf32, #tpu.memory_space<vmem>>, vector<1x8x256xf32>
    %4 = vector.shape_cast %3 : vector<1x8x256xf32> to vector<8x256xf32>
    %cst = arith.constant dense<0.000000e+00> : vector<8xf32>
    %5 = vector.multi_reduction <add>, %4, %cst [1] : vector<8x256xf32> to vector<8xf32>
    %6 = vector.shape_cast %5 : vector<8xf32> to vector<8x1xf32>
    %cst_3 = arith.constant 2.560000e+02 : f32
    %7 = vector.broadcast %cst_3 : f32 to vector<8x1xf32>
    %8 = arith.divf %6, %7 : vector<8x1xf32>
    %cst_4 = arith.constant dense<0xFF800000> : vector<8xf32>
    %9 = vector.multi_reduction <maximumf>, %4, %cst_4 [1] : vector<8x256xf32> to vector<8xf32>
    %10 = vector.shape_cast %9 : vector<8xf32> to vector<8x1xf32>
    %11 = arith.addf %8, %10 : vector<8x1xf32>
    %c1 = arith.constant 1 : index
    %c0_5 = arith.constant 0 : index
    %12 = vector.load %arg8[%c1, %c0_5] : memref<10x1xf32, #tpu.memory_space<vmem>>, vector<8x1xf32>
    tpu.vector_store %arg8[%c1, %c0_5], %11 {strides = array<i32>} : memref<10x1xf32, #tpu.memory_space<vmem>>, vector<8x1xf32>,
    %c0_6 = arith.constant 0 : index
    %13 = memref.load %arg4[%c0_6] : memref<3xf32, #tpu.memory_space<smem>>
    %c0_7 = arith.constant 0 : index
    %c0_8 = arith.constant 0 : index
    %14 = vector.load %arg8[%c0_7, %c0_8] : memref<10x1xf32, #tpu.memory_space<vmem>>, vector<8x1xf32>
    %15 = vector.broadcast %13 : f32 to vector<8x1xf32>
    %16 = arith.mulf %15, %14 : vector<8x1xf32>
    %c1_9 = arith.constant 1 : index
    %17 = memref.load %arg4[%c1_9] : memref<3xf32, #tpu.memory_space<smem>>
    %c1_10 = arith.constant 1 : index
    %c0_11 = arith.constant 0 : index
    %18 = vector.load %arg8[%c1_10, %c0_11] : memref<10x1xf32, #tpu.memory_space<vmem>>, vector<8x1xf32>
    %19 = vector.broadcast %17 : f32 to vector<8x1xf32>
    %20 = arith.mulf %19, %18 : vector<8x1xf32>
    %21 = arith.addf %16, %20 : vector<8x1xf32>
    %c2 = arith.constant 2 : index
    %22 = memref.load %arg4[%c2] : memref<3xf32, #tpu.memory_space<smem>>
    %c2_12 = arith.constant 2 : index
    %c0_13 = arith.constant 0 : index
    %23 = vector.load %arg8[%c2_12, %c0_13] : memref<10x1xf32, #tpu.memory_space<vmem>>, vector<8x1xf32>
    %24 = vector.broadcast %22 : f32 to vector<8x1xf32>
    %25 = arith.mulf %24, %23 : vector<8x1xf32>
    %26 = arith.addf %21, %25 : vector<8x1xf32>
    %27 = arith.negf %26 : vector<8x1xf32>
    %28 = math.exp %27 : vector<8x1xf32>
    %cst_14 = arith.constant 1.000000e+00 : f32
    %29 = vector.broadcast %cst_14 : f32 to vector<8x1xf32>
    %30 = arith.addf %29, %28 : vector<8x1xf32>
    %31 = arith.divf %29, %30 : vector<8x1xf32>
    %cst_15 = arith.constant dense<0.000000e+00> : vector<256xf32>
    %32 = vector.multi_reduction <add>, %4, %cst_15 [0] : vector<8x256xf32> to vector<256xf32>
    %33 = vector.shape_cast %32 : vector<256xf32> to vector<1x256xf32>
    %cst_16 = arith.constant 8.000000e+00 : f32
    %34 = vector.broadcast %cst_16 : f32 to vector<1x256xf32>
    %35 = arith.divf %33, %34 : vector<1x256xf32>
    %c0_17 = arith.constant 0 : index
    %c0_18 = arith.constant 0 : index
    %c51 = arith.constant 51 : index
    %36 = vector.load %arg7[%c0_17, %c0_18, %c51] : memref<2x1x358xf32, #tpu.memory_space<vmem>>, vector<1x1x256xf32>
    %37 = vector.shape_cast %36 : vector<1x1x256xf32> to vector<1x256xf32>
    %38 = vector.shape_cast %35 : vector<1x256xf32> to vector<1x1x256xf32>
    tpu.vector_store %arg7[%c0_17, %c0_18, %c51], %38 {strides = array<i32>} : memref<2x1x358xf32, #tpu.memory_space<vmem>>, vector<1x1x256xf32>,
    %cst_19 = arith.constant dense<0xFF800000> : vector<256xf32>
    %39 = vector.multi_reduction <maximumf>, %4, %cst_19 [0] : vector<8x256xf32> to vector<256xf32>
    %40 = vector.shape_cast %39 : vector<256xf32> to vector<1x256xf32>
    %c1_20 = arith.constant 1 : index
    %c0_21 = arith.constant 0 : index
    %c51_22 = arith.constant 51 : index
    %41 = vector.load %arg7[%c1_20, %c0_21, %c51_22] : memref<2x1x358xf32, #tpu.memory_space<vmem>>, vector<1x1x256xf32>
    %42 = vector.shape_cast %41 : vector<1x1x256xf32> to vector<1x256xf32>
    %43 = vector.shape_cast %40 : vector<1x256xf32> to vector<1x1x256xf32>
    tpu.vector_store %arg7[%c1_20, %c0_21, %c51_22], %43 {strides = array<i32>} : memref<2x1x358xf32, #tpu.memory_space<vmem>>, vector<1x1x256xf32>,
    %c0_23 = arith.constant 0 : index
    %c0_24 = arith.constant 0 : index
    %44 = vector.load %arg3[%c0_23, %c0_24] : memref<1x256xi32, #tpu.memory_space<vmem>>, vector<1x256xi32>
    %cst_25 = arith.constant 0.000000e+00 : f32
    %45 = vector.broadcast %cst_25 : f32 to vector<1x256xf32>
    %c-3_i32 = arith.constant -3 : i32
    %46 = vector.broadcast %c-3_i32 : i32 to vector<1x256xi32>
    %47 = arith.addi %44, %46 : vector<1x256xi32>
    %c0_i32_26 = arith.constant 0 : i32
    %48 = vector.broadcast %c0_i32_26 : i32 to vector<1x256xi32>
    %49 = arith.cmpi sge, %47, %48 : vector<1x256xi32>
    %c-3_i32_27 = arith.constant -3 : i32
    %50 = vector.broadcast %c-3_i32_27 : i32 to vector<1x256xi32>
    %51 = arith.addi %44, %50 : vector<1x256xi32>
    %c16_i32 = arith.constant 16 : i32
    %52 = vector.broadcast %c16_i32 : i32 to vector<1x256xi32>
    %53 = arith.cmpi slt, %51, %52 : vector<1x256xi32>
    %54 = arith.andi %49, %53 : vector<1x256xi1>
    %cst_28 = arith.constant 0.000000e+00 : f32
    %55 = vector.broadcast %cst_28 : f32 to vector<1x256xf32>
    %c0_29 = arith.constant 0 : index
    %c0_30 = arith.constant 0 : index
    %c0_31 = arith.constant 0 : index
    %56 = vector.load %arg7[%c0_29, %c0_30, %c0_31] : memref<2x1x358xf32, #tpu.memory_space<vmem>>, vector<1x1x256xf32>
    %57 = vector.shape_cast %56 : vector<1x1x256xf32> to vector<1x256xf32>
    %c1_32 = arith.constant 1 : index
    %c0_33 = arith.constant 0 : index
    %c0_34 = arith.constant 0 : index
    %58 = vector.load %arg7[%c1_32, %c0_33, %c0_34] : memref<2x1x358xf32, #tpu.memory_space<vmem>>, vector<1x1x256xf32>
    %59 = vector.shape_cast %58 : vector<1x1x256xf32> to vector<1x256xf32>
    %c0_35 = arith.constant 0 : index
    %60 = memref.load %arg5[%c0_35] : memref<98xf32, #tpu.memory_space<smem>>
    %61 = vector.broadcast %60 : f32 to vector<1x256xf32>
    %62 = arith.mulf %61, %57 : vector<1x256xf32>
    %63 = arith.addf %55, %62 : vector<1x256xf32>
    %c49 = arith.constant 49 : index
    %64 = memref.load %arg5[%c49] : memref<98xf32, #tpu.memory_space<smem>>
    %65 = vector.broadcast %64 : f32 to vector<1x256xf32>
    %66 = arith.mulf %65, %59 : vector<1x256xf32>
    %67 = arith.addf %63, %66 : vector<1x256xf32>
    %c0_36 = arith.constant 0 : index
    %c0_37 = arith.constant 0 : index
    %c16 = arith.constant 16 : index
    %68 = vector.load %arg7[%c0_36, %c0_37, %c16] : memref<2x1x358xf32, #tpu.memory_space<vmem>>, vector<1x1x256xf32>
    %69 = vector.shape_cast %68 : vector<1x1x256xf32> to vector<1x256xf32>
    %c1_38 = arith.constant 1 : index
    %c0_39 = arith.constant 0 : index
    %c16_40 = arith.constant 16 : index
    %70 = vector.load %arg7[%c1_38, %c0_39, %c16_40] : memref<2x1x358xf32, #tpu.memory_space<vmem>>, vector<1x1x256xf32>
    %71 = vector.shape_cast %70 : vector<1x1x256xf32> to vector<1x256xf32>
    %c7 = arith.constant 7 : index
    %72 = memref.load %arg5[%c7] : memref<98xf32, #tpu.memory_space<smem>>
    %73 = vector.broadcast %72 : f32 to vector<1x256xf32>
    %74 = arith.mulf %73, %69 : vector<1x256xf32>
    %75 = arith.addf %67, %74 : vector<1x256xf32>
    %c56 = arith.constant 56 : index
    %76 = memref.load %arg5[%c56] : memref<98xf32, #tpu.memory_space<smem>>
    %77 = vector.broadcast %76 : f32 to vector<1x256xf32>
    %78 = arith.mulf %77, %71 : vector<1x256xf32>
    %79 = arith.addf %75, %78 : vector<1x256xf32>
    %c0_41 = arith.constant 0 : index
    %c0_42 = arith.constant 0 : index
    %c32 = arith.constant 32 : index
    %80 = vector.load %arg7[%c0_41, %c0_42, %c32] : memref<2x1x358xf32, #tpu.memory_space<vmem>>, vector<1x1x256xf32>
    %81 = vector.shape_cast %80 : vector<1x1x256xf32> to vector<1x256xf32>
    %c1_43 = arith.constant 1 : index
    %c0_44 = arith.constant 0 : index
    %c32_45 = arith.constant 32 : index
    %82 = vector.load %arg7[%c1_43, %c0_44, %c32_45] : memref<2x1x358xf32, #tpu.memory_space<vmem>>, vector<1x1x256xf32>
    %83 = vector.shape_cast %82 : vector<1x1x256xf32> to vector<1x256xf32>
    %c14 = arith.constant 14 : index
    %84 = memref.load %arg5[%c14] : memref<98xf32, #tpu.memory_space<smem>>
    %85 = vector.broadcast %84 : f32 to vector<1x256xf32>
    %86 = arith.mulf %85, %81 : vector<1x256xf32>
    %87 = arith.addf %79, %86 : vector<1x256xf32>
    %c63 = arith.constant 63 : index
    %88 = memref.load %arg5[%c63] : memref<98xf32, #tpu.memory_space<smem>>
    %89 = vector.broadcast %88 : f32 to vector<1x256xf32>
    %90 = arith.mulf %89, %83 : vector<1x256xf32>
    %91 = arith.addf %87, %90 : vector<1x256xf32>
    %c0_46 = arith.constant 0 : index
    %c0_47 = arith.constant 0 : index
    %c48 = arith.constant 48 : index
    %92 = vector.load %arg7[%c0_46, %c0_47, %c48] : memref<2x1x358xf32, #tpu.memory_space<vmem>>, vector<1x1x256xf32>
    %93 = vector.shape_cast %92 : vector<1x1x256xf32> to vector<1x256xf32>
    %c1_48 = arith.constant 1 : index
    %c0_49 = arith.constant 0 : index
    %c48_50 = arith.constant 48 : index
    %94 = vector.load %arg7[%c1_48, %c0_49, %c48_50] : memref<2x1x358xf32, #tpu.memory_space<vmem>>, vector<1x1x256xf32>
    %95 = vector.shape_cast %94 : vector<1x1x256xf32> to vector<1x256xf32>
    %c21 = arith.constant 21 : index
    %96 = memref.load %arg5[%c21] : memref<98xf32, #tpu.memory_space<smem>>
    %97 = vector.broadcast %96 : f32 to vector<1x256xf32>
    %98 = arith.mulf %97, %93 : vector<1x256xf32>
    %99 = arith.addf %91, %98 : vector<1x256xf32>
    %c70 = arith.constant 70 : index
    %100 = memref.load %arg5[%c70] : memref<98xf32, #tpu.memory_space<smem>>
    %101 = vector.broadcast %100 : f32 to vector<1x256xf32>
    %102 = arith.mulf %101, %95 : vector<1x256xf32>
    %103 = arith.addf %99, %102 : vector<1x256xf32>
    %c0_51 = arith.constant 0 : index
    %c0_52 = arith.constant 0 : index
    %c64 = arith.constant 64 : index
    %104 = vector.load %arg7[%c0_51, %c0_52, %c64] : memref<2x1x358xf32, #tpu.memory_space<vmem>>, vector<1x1x256xf32>
    %105 = vector.shape_cast %104 : vector<1x1x256xf32> to vector<1x256xf32>
    %c1_53 = arith.constant 1 : index
    %c0_54 = arith.constant 0 : index
    %c64_55 = arith.constant 64 : index
    %106 = vector.load %arg7[%c1_53, %c0_54, %c64_55] : memref<2x1x358xf32, #tpu.memory_space<vmem>>, vector<1x1x256xf32>
    %107 = vector.shape_cast %106 : vector<1x1x256xf32> to vector<1x256xf32>
    %c28 = arith.constant 28 : index
    %108 = memref.load %arg5[%c28] : memref<98xf32, #tpu.memory_space<smem>>
    %109 = vector.broadcast %108 : f32 to vector<1x256xf32>
    %110 = arith.mulf %109, %105 : vector<1x256xf32>
    %111 = arith.addf %103, %110 : vector<1x256xf32>
    %c77 = arith.constant 77 : index
    %112 = memref.load %arg5[%c77] : memref<98xf32, #tpu.memory_space<smem>>
    %113 = vector.broadcast %112 : f32 to vector<1x256xf32>
    %114 = arith.mulf %113, %107 : vector<1x256xf32>
    %115 = arith.addf %111, %114 : vector<1x256xf32>
    %c0_56 = arith.constant 0 : index
    %c0_57 = arith.constant 0 : index
    %c80 = arith.constant 80 : index
    %116 = vector.load %arg7[%c0_56, %c0_57, %c80] : memref<2x1x358xf32, #tpu.memory_space<vmem>>, vector<1x1x256xf32>
    %117 = vector.shape_cast %116 : vector<1x1x256xf32> to vector<1x256xf32>
    %c1_58 = arith.constant 1 : index
    %c0_59 = arith.constant 0 : index
    %c80_60 = arith.constant 80 : index
    %118 = vector.load %arg7[%c1_58, %c0_59, %c80_60] : memref<2x1x358xf32, #tpu.memory_space<vmem>>, vector<1x1x256xf32>
    %119 = vector.shape_cast %118 : vector<1x1x256xf32> to vector<1x256xf32>
    %c35 = arith.constant 35 : index
    %120 = memref.load %arg5[%c35] : memref<98xf32, #tpu.memory_space<smem>>
    %121 = vector.broadcast %120 : f32 to vector<1x256xf32>
    %122 = arith.mulf %121, %117 : vector<1x256xf32>
    %123 = arith.addf %115, %122 : vector<1x256xf32>
    %c84 = arith.constant 84 : index
    %124 = memref.load %arg5[%c84] : memref<98xf32, #tpu.memory_space<smem>>
    %125 = vector.broadcast %124 : f32 to vector<1x256xf32>
    %126 = arith.mulf %125, %119 : vector<1x256xf32>
    %127 = arith.addf %123, %126 : vector<1x256xf32>
    %c0_61 = arith.constant 0 : index
    %c0_62 = arith.constant 0 : index
    %c96 = arith.constant 96 : index
    %128 = vector.load %arg7[%c0_61, %c0_62, %c96] : memref<2x1x358xf32, #tpu.memory_space<vmem>>, vector<1x1x256xf32>
    %129 = vector.shape_cast %128 : vector<1x1x256xf32> to vector<1x256xf32>
    %c1_63 = arith.constant 1 : index
    %c0_64 = arith.constant 0 : index
    %c96_65 = arith.constant 96 : index
    %130 = vector.load %arg7[%c1_63, %c0_64, %c96_65] : memref<2x1x358xf32, #tpu.memory_space<vmem>>, vector<1x1x256xf32>
    %131 = vector.shape_cast %130 : vector<1x1x256xf32> to vector<1x256xf32>
    %c42 = arith.constant 42 : index
    %132 = memref.load %arg5[%c42] : memref<98xf32, #tpu.memory_space<smem>>
    %133 = vector.broadcast %132 : f32 to vector<1x256xf32>
    %134 = arith.mulf %133, %129 : vector<1x256xf32>
    %135 = arith.addf %127, %134 : vector<1x256xf32>
    %c91 = arith.constant 91 : index
    %136 = memref.load %arg5[%c91] : memref<98xf32, #tpu.memory_space<smem>>
    %137 = vector.broadcast %136 : f32 to vector<1x256xf32>
    %138 = arith.mulf %137, %131 : vector<1x256xf32>
    %139 = arith.addf %135, %138 : vector<1x256xf32>
    %cst_66 = arith.constant 0.000000e+00 : f32
    %140 = vector.broadcast %cst_66 : f32 to vector<1x256xf32>
    %141 = arith.select %54, %139, %140 : vector<1x256xi1>, vector<1x256xf32>
    %142 = arith.addf %45, %141 : vector<1x256xf32>
    %c-2_i32 = arith.constant -2 : i32
    %143 = vector.broadcast %c-2_i32 : i32 to vector<1x256xi32>
    %144 = arith.addi %44, %143 : vector<1x256xi32>
    %c0_i32_67 = arith.constant 0 : i32
    %145 = vector.broadcast %c0_i32_67 : i32 to vector<1x256xi32>
    %146 = arith.cmpi sge, %144, %145 : vector<1x256xi32>
    %c-2_i32_68 = arith.constant -2 : i32
    %147 = vector.broadcast %c-2_i32_68 : i32 to vector<1x256xi32>
    %148 = arith.addi %44, %147 : vector<1x256xi32>
    %c16_i32_69 = arith.constant 16 : i32
    %149 = vector.broadcast %c16_i32_69 : i32 to vector<1x256xi32>
    %150 = arith.cmpi slt, %148, %149 : vector<1x256xi32>
    %151 = arith.andi %146, %150 : vector<1x256xi1>
    %cst_70 = arith.constant 0.000000e+00 : f32
    %152 = vector.broadcast %cst_70 : f32 to vector<1x256xf32>
    %c0_71 = arith.constant 0 : index
    %c0_72 = arith.constant 0 : index
    %c1_73 = arith.constant 1 : index
    %153 = vector.load %arg7[%c0_71, %c0_72, %c1_73] : memref<2x1x358xf32, #tpu.memory_space<vmem>>, vector<1x1x256xf32>
    %154 = vector.shape_cast %153 : vector<1x1x256xf32> to vector<1x256xf32>
    %c1_74 = arith.constant 1 : index
    %c0_75 = arith.constant 0 : index
    %c1_76 = arith.constant 1 : index
    %155 = vector.load %arg7[%c1_74, %c0_75, %c1_76] : memref<2x1x358xf32, #tpu.memory_space<vmem>>, vector<1x1x256xf32>
    %156 = vector.shape_cast %155 : vector<1x1x256xf32> to vector<1x256xf32>
    %c1_77 = arith.constant 1 : index
    %157 = memref.load %arg5[%c1_77] : memref<98xf32, #tpu.memory_space<smem>>
    %158 = vector.broadcast %157 : f32 to vector<1x256xf32>
    %159 = arith.mulf %158, %154 : vector<1x256xf32>
    %160 = arith.addf %152, %159 : vector<1x256xf32>
    %c50 = arith.constant 50 : index
    %161 = memref.load %arg5[%c50] : memref<98xf32, #tpu.memory_space<smem>>
    %162 = vector.broadcast %161 : f32 to vector<1x256xf32>
    %163 = arith.mulf %162, %156 : vector<1x256xf32>
    %164 = arith.addf %160, %163 : vector<1x256xf32>
    %c0_78 = arith.constant 0 : index
    %c0_79 = arith.constant 0 : index
    %c17 = arith.constant 17 : index
    %165 = vector.load %arg7[%c0_78, %c0_79, %c17] : memref<2x1x358xf32, #tpu.memory_space<vmem>>, vector<1x1x256xf32>
    %166 = vector.shape_cast %165 : vector<1x1x256xf32> to vector<1x256xf32>
    %c1_80 = arith.constant 1 : index
    %c0_81 = arith.constant 0 : index
    %c17_82 = arith.constant 17 : index
    %167 = vector.load %arg7[%c1_80, %c0_81, %c17_82] : memref<2x1x358xf32, #tpu.memory_space<vmem>>, vector<1x1x256xf32>
    %168 = vector.shape_cast %167 : vector<1x1x256xf32> to vector<1x256xf32>
    %c8 = arith.constant 8 : index
    %169 = memref.load %arg5[%c8] : memref<98xf32, #tpu.memory_space<smem>>
    %170 = vector.broadcast %169 : f32 to vector<1x256xf32>
    %171 = arith.mulf %170, %166 : vector<1x256xf32>
    %172 = arith.addf %164, %171 : vector<1x256xf32>
    %c57 = arith.constant 57 : index
    %173 = memref.load %arg5[%c57] : memref<98xf32, #tpu.memory_space<smem>>
    %174 = vector.broadcast %173 : f32 to vector<1x256xf32>
    %175 = arith.mulf %174, %168 : vector<1x256xf32>
    %176 = arith.addf %172, %175 : vector<1x256xf32>
    %c0_83 = arith.constant 0 : index
    %c0_84 = arith.constant 0 : index
    %c33 = arith.constant 33 : index
    %177 = vector.load %arg7[%c0_83, %c0_84, %c33] : memref<2x1x358xf32, #tpu.memory_space<vmem>>, vector<1x1x256xf32>
    %178 = vector.shape_cast %177 : vector<1x1x256xf32> to vector<1x256xf32>
    %c1_85 = arith.constant 1 : index
    %c0_86 = arith.constant 0 : index
    %c33_87 = arith.constant 33 : index
    %179 = vector.load %arg7[%c1_85, %c0_86, %c33_87] : memref<2x1x358xf32, #tpu.memory_space<vmem>>, vector<1x1x256xf32>
    %180 = vector.shape_cast %179 : vector<1x1x256xf32> to vector<1x256xf32>
    %c15 = arith.constant 15 : index
    %181 = memref.load %arg5[%c15] : memref<98xf32, #tpu.memory_space<smem>>
    %182 = vector.broadcast %181 : f32 to vector<1x256xf32>
    %183 = arith.mulf %182, %178 : vector<1x256xf32>
    %184 = arith.addf %176, %183 : vector<1x256xf32>
    %c64_88 = arith.constant 64 : index
    %185 = memref.load %arg5[%c64_88] : memref<98xf32, #tpu.memory_space<smem>>
    %186 = vector.broadcast %185 : f32 to vector<1x256xf32>
    %187 = arith.mulf %186, %180 : vector<1x256xf32>
    %188 = arith.addf %184, %187 : vector<1x256xf32>
    %c0_89 = arith.constant 0 : index
    %c0_90 = arith.constant 0 : index
    %c49_91 = arith.constant 49 : index
    %189 = vector.load %arg7[%c0_89, %c0_90, %c49_91] : memref<2x1x358xf32, #tpu.memory_space<vmem>>, vector<1x1x256xf32>
    %190 = vector.shape_cast %189 : vector<1x1x256xf32> to vector<1x256xf32>
    %c1_92 = arith.constant 1 : index
    %c0_93 = arith.constant 0 : index
    %c49_94 = arith.constant 49 : index
    %191 = vector.load %arg7[%c1_92, %c0_93, %c49_94] : memref<2x1x358xf32, #tpu.memory_space<vmem>>, vector<1x1x256xf32>
    %192 = vector.shape_cast %191 : vector<1x1x256xf32> to vector<1x256xf32>
    %c22 = arith.constant 22 : index
    %193 = memref.load %arg5[%c22] : memref<98xf32, #tpu.memory_space<smem>>
    %194 = vector.broadcast %193 : f32 to vector<1x256xf32>
    %195 = arith.mulf %194, %190 : vector<1x256xf32>
    %196 = arith.addf %188, %195 : vector<1x256xf32>
    %c71 = arith.constant 71 : index
    %197 = memref.load %arg5[%c71] : memref<98xf32, #tpu.memory_space<smem>>
    %198 = vector.broadcast %197 : f32 to vector<1x256xf32>
    %199 = arith.mulf %198, %192 : vector<1x256xf32>
    %200 = arith.addf %196, %199 : vector<1x256xf32>
    %c0_95 = arith.constant 0 : index
    %c0_96 = arith.constant 0 : index
    %c65 = arith.constant 65 : index
    %201 = vector.load %arg7[%c0_95, %c0_96, %c65] : memref<2x1x358xf32, #tpu.memory_space<vmem>>, vector<1x1x256xf32>
    %202 = vector.shape_cast %201 : vector<1x1x256xf32> to vector<1x256xf32>
    %c1_97 = arith.constant 1 : index
    %c0_98 = arith.constant 0 : index
    %c65_99 = arith.constant 65 : index
    %203 = vector.load %arg7[%c1_97, %c0_98, %c65_99] : memref<2x1x358xf32, #tpu.memory_space<vmem>>, vector<1x1x256xf32>
    %204 = vector.shape_cast %203 : vector<1x1x256xf32> to vector<1x256xf32>
    %c29 = arith.constant 29 : index
    %205 = memref.load %arg5[%c29] : memref<98xf32, #tpu.memory_space<smem>>
    %206 = vector.broadcast %205 : f32 to vector<1x256xf32>
    %207 = arith.mulf %206, %202 : vector<1x256xf32>
    %208 = arith.addf %200, %207 : vector<1x256xf32>
    %c78 = arith.constant 78 : index
    %209 = memref.load %arg5[%c78] : memref<98xf32, #tpu.memory_space<smem>>
    %210 = vector.broadcast %209 : f32 to vector<1x256xf32>
    %211 = arith.mulf %210, %204 : vector<1x256xf32>
    %212 = arith.addf %208, %211 : vector<1x256xf32>
    %c0_100 = arith.constant 0 : index
    %c0_101 = arith.constant 0 : index
    %c81 = arith.constant 81 : index
    %213 = vector.load %arg7[%c0_100, %c0_101, %c81] : memref<2x1x358xf32, #tpu.memory_space<vmem>>, vector<1x1x256xf32>
    %214 = vector.shape_cast %213 : vector<1x1x256xf32> to vector<1x256xf32>
    %c1_102 = arith.constant 1 : index
    %c0_103 = arith.constant 0 : index
    %c81_104 = arith.constant 81 : index
    %215 = vector.load %arg7[%c1_102, %c0_103, %c81_104] : memref<2x1x358xf32, #tpu.memory_space<vmem>>, vector<1x1x256xf32>
    %216 = vector.shape_cast %215 : vector<1x1x256xf32> to vector<1x256xf32>
    %c36 = arith.constant 36 : index
    %217 = memref.load %arg5[%c36] : memref<98xf32, #tpu.memory_space<smem>>
    %218 = vector.broadcast %217 : f32 to vector<1x256xf32>
    %219 = arith.mulf %218, %214 : vector<1x256xf32>
    %220 = arith.addf %212, %219 : vector<1x256xf32>
    %c85 = arith.constant 85 : index
    %221 = memref.load %arg5[%c85] : memref<98xf32, #tpu.memory_space<smem>>
    %222 = vector.broadcast %221 : f32 to vector<1x256xf32>
    %223 = arith.mulf %222, %216 : vector<1x256xf32>
    %224 = arith.addf %220, %223 : vector<1x256xf32>
    %c0_105 = arith.constant 0 : index
    %c0_106 = arith.constant 0 : index
    %c97 = arith.constant 97 : index
    %225 = vector.load %arg7[%c0_105, %c0_106, %c97] : memref<2x1x358xf32, #tpu.memory_space<vmem>>, vector<1x1x256xf32>
    %226 = vector.shape_cast %225 : vector<1x1x256xf32> to vector<1x256xf32>
    %c1_107 = arith.constant 1 : index
    %c0_108 = arith.constant 0 : index
    %c97_109 = arith.constant 97 : index
    %227 = vector.load %arg7[%c1_107, %c0_108, %c97_109] : memref<2x1x358xf32, #tpu.memory_space<vmem>>, vector<1x1x256xf32>
    %228 = vector.shape_cast %227 : vector<1x1x256xf32> to vector<1x256xf32>
    %c43 = arith.constant 43 : index
    %229 = memref.load %arg5[%c43] : memref<98xf32, #tpu.memory_space<smem>>
    %230 = vector.broadcast %229 : f32 to vector<1x256xf32>
    %231 = arith.mulf %230, %226 : vector<1x256xf32>
    %232 = arith.addf %224, %231 : vector<1x256xf32>
    %c92 = arith.constant 92 : index
    %233 = memref.load %arg5[%c92] : memref<98xf32, #tpu.memory_space<smem>>
    %234 = vector.broadcast %233 : f32 to vector<1x256xf32>
    %235 = arith.mulf %234, %228 : vector<1x256xf32>
    %236 = arith.addf %232, %235 : vector<1x256xf32>
    %cst_110 = arith.constant 0.000000e+00 : f32
    %237 = vector.broadcast %cst_110 : f32 to vector<1x256xf32>
    %238 = arith.select %151, %236, %237 : vector<1x256xi1>, vector<1x256xf32>
    %239 = arith.addf %142, %238 : vector<1x256xf32>
    %c-1_i32 = arith.constant -1 : i32
    %240 = vector.broadcast %c-1_i32 : i32 to vector<1x256xi32>
    %241 = arith.addi %44, %240 : vector<1x256xi32>
    %c0_i32_111 = arith.constant 0 : i32
    %242 = vector.broadcast %c0_i32_111 : i32 to vector<1x256xi32>
    %243 = arith.cmpi sge, %241, %242 : vector<1x256xi32>
    %c-1_i32_112 = arith.constant -1 : i32
    %244 = vector.broadcast %c-1_i32_112 : i32 to vector<1x256xi32>
    %245 = arith.addi %44, %244 : vector<1x256xi32>
    %c16_i32_113 = arith.constant 16 : i32
    %246 = vector.broadcast %c16_i32_113 : i32 to vector<1x256xi32>
    %247 = arith.cmpi slt, %245, %246 : vector<1x256xi32>
    %248 = arith.andi %243, %247 : vector<1x256xi1>
    %cst_114 = arith.constant 0.000000e+00 : f32
    %249 = vector.broadcast %cst_114 : f32 to vector<1x256xf32>
    %c0_115 = arith.constant 0 : index
    %c0_116 = arith.constant 0 : index
    %c2_117 = arith.constant 2 : index
    %250 = vector.load %arg7[%c0_115, %c0_116, %c2_117] : memref<2x1x358xf32, #tpu.memory_space<vmem>>, vector<1x1x256xf32>
    %251 = vector.shape_cast %250 : vector<1x1x256xf32> to vector<1x256xf32>
    %c1_118 = arith.constant 1 : index
    %c0_119 = arith.constant 0 : index
    %c2_120 = arith.constant 2 : index
    %252 = vector.load %arg7[%c1_118, %c0_119, %c2_120] : memref<2x1x358xf32, #tpu.memory_space<vmem>>, vector<1x1x256xf32>
    %253 = vector.shape_cast %252 : vector<1x1x256xf32> to vector<1x256xf32>
    %c2_121 = arith.constant 2 : index
    %254 = memref.load %arg5[%c2_121] : memref<98xf32, #tpu.memory_space<smem>>
    %255 = vector.broadcast %254 : f32 to vector<1x256xf32>
    %256 = arith.mulf %255, %251 : vector<1x256xf32>
    %257 = arith.addf %249, %256 : vector<1x256xf32>
    %c51_122 = arith.constant 51 : index
    %258 = memref.load %arg5[%c51_122] : memref<98xf32, #tpu.memory_space<smem>>
    %259 = vector.broadcast %258 : f32 to vector<1x256xf32>
    %260 = arith.mulf %259, %253 : vector<1x256xf32>
    %261 = arith.addf %257, %260 : vector<1x256xf32>
    %c0_123 = arith.constant 0 : index
    %c0_124 = arith.constant 0 : index
    %c18 = arith.constant 18 : index
    %262 = vector.load %arg7[%c0_123, %c0_124, %c18] : memref<2x1x358xf32, #tpu.memory_space<vmem>>, vector<1x1x256xf32>
    %263 = vector.shape_cast %262 : vector<1x1x256xf32> to vector<1x256xf32>
    %c1_125 = arith.constant 1 : index
    %c0_126 = arith.constant 0 : index
    %c18_127 = arith.constant 18 : index
    %264 = vector.load %arg7[%c1_125, %c0_126, %c18_127] : memref<2x1x358xf32, #tpu.memory_space<vmem>>, vector<1x1x256xf32>
    %265 = vector.shape_cast %264 : vector<1x1x256xf32> to vector<1x256xf32>
    %c9 = arith.constant 9 : index
    %266 = memref.load %arg5[%c9] : memref<98xf32, #tpu.memory_space<smem>>
    %267 = vector.broadcast %266 : f32 to vector<1x256xf32>
    %268 = arith.mulf %267, %263 : vector<1x256xf32>
    %269 = arith.addf %261, %268 : vector<1x256xf32>
    %c58 = arith.constant 58 : index
    %270 = memref.load %arg5[%c58] : memref<98xf32, #tpu.memory_space<smem>>
    %271 = vector.broadcast %270 : f32 to vector<1x256xf32>
    %272 = arith.mulf %271, %265 : vector<1x256xf32>
    %273 = arith.addf %269, %272 : vector<1x256xf32>
    %c0_128 = arith.constant 0 : index
    %c0_129 = arith.constant 0 : index
    %c34 = arith.constant 34 : index
    %274 = vector.load %arg7[%c0_128, %c0_129, %c34] : memref<2x1x358xf32, #tpu.memory_space<vmem>>, vector<1x1x256xf32>
    %275 = vector.shape_cast %274 : vector<1x1x256xf32> to vector<1x256xf32>
    %c1_130 = arith.constant 1 : index
    %c0_131 = arith.constant 0 : index
    %c34_132 = arith.constant 34 : index
    %276 = vector.load %arg7[%c1_130, %c0_131, %c34_132] : memref<2x1x358xf32, #tpu.memory_space<vmem>>, vector<1x1x256xf32>
    %277 = vector.shape_cast %276 : vector<1x1x256xf32> to vector<1x256xf32>
    %c16_133 = arith.constant 16 : index
    %278 = memref.load %arg5[%c16_133] : memref<98xf32, #tpu.memory_space<smem>>
    %279 = vector.broadcast %278 : f32 to vector<1x256xf32>
    %280 = arith.mulf %279, %275 : vector<1x256xf32>
    %281 = arith.addf %273, %280 : vector<1x256xf32>
    %c65_134 = arith.constant 65 : index
    %282 = memref.load %arg5[%c65_134] : memref<98xf32, #tpu.memory_space<smem>>
    %283 = vector.broadcast %282 : f32 to vector<1x256xf32>
    %284 = arith.mulf %283, %277 : vector<1x256xf32>
    %285 = arith.addf %281, %284 : vector<1x256xf32>
    %c0_135 = arith.constant 0 : index
    %c0_136 = arith.constant 0 : index
    %c50_137 = arith.constant 50 : index
    %286 = vector.load %arg7[%c0_135, %c0_136, %c50_137] : memref<2x1x358xf32, #tpu.memory_space<vmem>>, vector<1x1x256xf32>
    %287 = vector.shape_cast %286 : vector<1x1x256xf32> to vector<1x256xf32>
    %c1_138 = arith.constant 1 : index
    %c0_139 = arith.constant 0 : index
    %c50_140 = arith.constant 50 : index
    %288 = vector.load %arg7[%c1_138, %c0_139, %c50_140] : memref<2x1x358xf32, #tpu.memory_space<vmem>>, vector<1x1x256xf32>
    %289 = vector.shape_cast %288 : vector<1x1x256xf32> to vector<1x256xf32>
    %c23 = arith.constant 23 : index
    %290 = memref.load %arg5[%c23] : memref<98xf32, #tpu.memory_space<smem>>
    %291 = vector.broadcast %290 : f32 to vector<1x256xf32>
    %292 = arith.mulf %291, %287 : vector<1x256xf32>
    %293 = arith.addf %285, %292 : vector<1x256xf32>
    %c72 = arith.constant 72 : index
    %294 = memref.load %arg5[%c72] : memref<98xf32, #tpu.memory_space<smem>>
    %295 = vector.broadcast %294 : f32 to vector<1x256xf32>
    %296 = arith.mulf %295, %289 : vector<1x256xf32>
    %297 = arith.addf %293, %296 : vector<1x256xf32>
    %c0_141 = arith.constant 0 : index
    %c0_142 = arith.constant 0 : index
    %c66 = arith.constant 66 : index
    %298 = vector.load %arg7[%c0_141, %c0_142, %c66] : memref<2x1x358xf32, #tpu.memory_space<vmem>>, vector<1x1x256xf32>
    %299 = vector.shape_cast %298 : vector<1x1x256xf32> to vector<1x256xf32>
    %c1_143 = arith.constant 1 : index
    %c0_144 = arith.constant 0 : index
    %c66_145 = arith.constant 66 : index
    %300 = vector.load %arg7[%c1_143, %c0_144, %c66_145] : memref<2x1x358xf32, #tpu.memory_space<vmem>>, vector<1x1x256xf32>
    %301 = vector.shape_cast %300 : vector<1x1x256xf32> to vector<1x256xf32>
    %c30 = arith.constant 30 : index
    %302 = memref.load %arg5[%c30] : memref<98xf32, #tpu.memory_space<smem>>
    %303 = vector.broadcast %302 : f32 to vector<1x256xf32>
    %304 = arith.mulf %303, %299 : vector<1x256xf32>
    %305 = arith.addf %297, %304 : vector<1x256xf32>
    %c79 = arith.constant 79 : index
    %306 = memref.load %arg5[%c79] : memref<98xf32, #tpu.memory_space<smem>>
    %307 = vector.broadcast %306 : f32 to vector<1x256xf32>
    %308 = arith.mulf %307, %301 : vector<1x256xf32>
    %309 = arith.addf %305, %308 : vector<1x256xf32>
    %c0_146 = arith.constant 0 : index
    %c0_147 = arith.constant 0 : index
    %c82 = arith.constant 82 : index
    %310 = vector.load %arg7[%c0_146, %c0_147, %c82] : memref<2x1x358xf32, #tpu.memory_space<vmem>>, vector<1x1x256xf32>
    %311 = vector.shape_cast %310 : vector<1x1x256xf32> to vector<1x256xf32>
    %c1_148 = arith.constant 1 : index
    %c0_149 = arith.constant 0 : index
    %c82_150 = arith.constant 82 : index
    %312 = vector.load %arg7[%c1_148, %c0_149, %c82_150] : memref<2x1x358xf32, #tpu.memory_space<vmem>>, vector<1x1x256xf32>
    %313 = vector.shape_cast %312 : vector<1x1x256xf32> to vector<1x256xf32>
    %c37 = arith.constant 37 : index
    %314 = memref.load %arg5[%c37] : memref<98xf32, #tpu.memory_space<smem>>
    %315 = vector.broadcast %314 : f32 to vector<1x256xf32>
    %316 = arith.mulf %315, %311 : vector<1x256xf32>
    %317 = arith.addf %309, %316 : vector<1x256xf32>
    %c86 = arith.constant 86 : index
    %318 = memref.load %arg5[%c86] : memref<98xf32, #tpu.memory_space<smem>>
    %319 = vector.broadcast %318 : f32 to vector<1x256xf32>
    %320 = arith.mulf %319, %313 : vector<1x256xf32>
    %321 = arith.addf %317, %320 : vector<1x256xf32>
    %c0_151 = arith.constant 0 : index
    %c0_152 = arith.constant 0 : index
    %c98 = arith.constant 98 : index
    %322 = vector.load %arg7[%c0_151, %c0_152, %c98] : memref<2x1x358xf32, #tpu.memory_space<vmem>>, vector<1x1x256xf32>
    %323 = vector.shape_cast %322 : vector<1x1x256xf32> to vector<1x256xf32>
    %c1_153 = arith.constant 1 : index
    %c0_154 = arith.constant 0 : index
    %c98_155 = arith.constant 98 : index
    %324 = vector.load %arg7[%c1_153, %c0_154, %c98_155] : memref<2x1x358xf32, #tpu.memory_space<vmem>>, vector<1x1x256xf32>
    %325 = vector.shape_cast %324 : vector<1x1x256xf32> to vector<1x256xf32>
    %c44 = arith.constant 44 : index
    %326 = memref.load %arg5[%c44] : memref<98xf32, #tpu.memory_space<smem>>
    %327 = vector.broadcast %326 : f32 to vector<1x256xf32>
    %328 = arith.mulf %327, %323 : vector<1x256xf32>
    %329 = arith.addf %321, %328 : vector<1x256xf32>
    %c93 = arith.constant 93 : index
    %330 = memref.load %arg5[%c93] : memref<98xf32, #tpu.memory_space<smem>>
    %331 = vector.broadcast %330 : f32 to vector<1x256xf32>
    %332 = arith.mulf %331, %325 : vector<1x256xf32>
    %333 = arith.addf %329, %332 : vector<1x256xf32>
    %cst_156 = arith.constant 0.000000e+00 : f32
    %334 = vector.broadcast %cst_156 : f32 to vector<1x256xf32>
    %335 = arith.select %248, %333, %334 : vector<1x256xi1>, vector<1x256xf32>
    %336 = arith.addf %239, %335 : vector<1x256xf32>
    %c0_i32_157 = arith.constant 0 : i32
    %337 = vector.broadcast %c0_i32_157 : i32 to vector<1x256xi32>
    %338 = arith.addi %44, %337 : vector<1x256xi32>
    %c0_i32_158 = arith.constant 0 : i32
    %339 = vector.broadcast %c0_i32_158 : i32 to vector<1x256xi32>
    %340 = arith.cmpi sge, %338, %339 : vector<1x256xi32>
    %c0_i32_159 = arith.constant 0 : i32
    %341 = vector.broadcast %c0_i32_159 : i32 to vector<1x256xi32>
    %342 = arith.addi %44, %341 : vector<1x256xi32>
    %c16_i32_160 = arith.constant 16 : i32
    %343 = vector.broadcast %c16_i32_160 : i32 to vector<1x256xi32>
    %344 = arith.cmpi slt, %342, %343 : vector<1x256xi32>
    %345 = arith.andi %340, %344 : vector<1x256xi1>
    %cst_161 = arith.constant 0.000000e+00 : f32
    %346 = vector.broadcast %cst_161 : f32 to vector<1x256xf32>
    %c0_162 = arith.constant 0 : index
    %c0_163 = arith.constant 0 : index
    %c3 = arith.constant 3 : index
    %347 = vector.load %arg7[%c0_162, %c0_163, %c3] : memref<2x1x358xf32, #tpu.memory_space<vmem>>, vector<1x1x256xf32>
    %348 = vector.shape_cast %347 : vector<1x1x256xf32> to vector<1x256xf32>
    %c1_164 = arith.constant 1 : index
    %c0_165 = arith.constant 0 : index
    %c3_166 = arith.constant 3 : index
    %349 = vector.load %arg7[%c1_164, %c0_165, %c3_166] : memref<2x1x358xf32, #tpu.memory_space<vmem>>, vector<1x1x256xf32>
    %350 = vector.shape_cast %349 : vector<1x1x256xf32> to vector<1x256xf32>
    %c3_167 = arith.constant 3 : index
    %351 = memref.load %arg5[%c3_167] : memref<98xf32, #tpu.memory_space<smem>>
    %352 = vector.broadcast %351 : f32 to vector<1x256xf32>
    %353 = arith.mulf %352, %348 : vector<1x256xf32>
    %354 = arith.addf %346, %353 : vector<1x256xf32>
    %c52 = arith.constant 52 : index
    %355 = memref.load %arg5[%c52] : memref<98xf32, #tpu.memory_space<smem>>
    %356 = vector.broadcast %355 : f32 to vector<1x256xf32>
    %357 = arith.mulf %356, %350 : vector<1x256xf32>
    %358 = arith.addf %354, %357 : vector<1x256xf32>
    %c0_168 = arith.constant 0 : index
    %c0_169 = arith.constant 0 : index
    %c19 = arith.constant 19 : index
    %359 = vector.load %arg7[%c0_168, %c0_169, %c19] : memref<2x1x358xf32, #tpu.memory_space<vmem>>, vector<1x1x256xf32>
    %360 = vector.shape_cast %359 : vector<1x1x256xf32> to vector<1x256xf32>
    %c1_170 = arith.constant 1 : index
    %c0_171 = arith.constant 0 : index
    %c19_172 = arith.constant 19 : index
    %361 = vector.load %arg7[%c1_170, %c0_171, %c19_172] : memref<2x1x358xf32, #tpu.memory_space<vmem>>, vector<1x1x256xf32>
    %362 = vector.shape_cast %361 : vector<1x1x256xf32> to vector<1x256xf32>
    %c10 = arith.constant 10 : index
    %363 = memref.load %arg5[%c10] : memref<98xf32, #tpu.memory_space<smem>>
    %364 = vector.broadcast %363 : f32 to vector<1x256xf32>
    %365 = arith.mulf %364, %360 : vector<1x256xf32>
    %366 = arith.addf %358, %365 : vector<1x256xf32>
    %c59 = arith.constant 59 : index
    %367 = memref.load %arg5[%c59] : memref<98xf32, #tpu.memory_space<smem>>
    %368 = vector.broadcast %367 : f32 to vector<1x256xf32>
    %369 = arith.mulf %368, %362 : vector<1x256xf32>
    %370 = arith.addf %366, %369 : vector<1x256xf32>
    %c0_173 = arith.constant 0 : index
    %c0_174 = arith.constant 0 : index
    %c35_175 = arith.constant 35 : index
    %371 = vector.load %arg7[%c0_173, %c0_174, %c35_175] : memref<2x1x358xf32, #tpu.memory_space<vmem>>, vector<1x1x256xf32>
    %372 = vector.shape_cast %371 : vector<1x1x256xf32> to vector<1x256xf32>
    %c1_176 = arith.constant 1 : index
    %c0_177 = arith.constant 0 : index
    %c35_178 = arith.constant 35 : index
    %373 = vector.load %arg7[%c1_176, %c0_177, %c35_178] : memref<2x1x358xf32, #tpu.memory_space<vmem>>, vector<1x1x256xf32>
    %374 = vector.shape_cast %373 : vector<1x1x256xf32> to vector<1x256xf32>
    %c17_179 = arith.constant 17 : index
    %375 = memref.load %arg5[%c17_179] : memref<98xf32, #tpu.memory_space<smem>>
    %376 = vector.broadcast %375 : f32 to vector<1x256xf32>
    %377 = arith.mulf %376, %372 : vector<1x256xf32>
    %378 = arith.addf %370, %377 : vector<1x256xf32>
    %c66_180 = arith.constant 66 : index
    %379 = memref.load %arg5[%c66_180] : memref<98xf32, #tpu.memory_space<smem>>
    %380 = vector.broadcast %379 : f32 to vector<1x256xf32>
    %381 = arith.mulf %380, %374 : vector<1x256xf32>
    %382 = arith.addf %378, %381 : vector<1x256xf32>
    %c0_181 = arith.constant 0 : index
    %c0_182 = arith.constant 0 : index
    %c51_183 = arith.constant 51 : index
    %383 = vector.load %arg7[%c0_181, %c0_182, %c51_183] : memref<2x1x358xf32, #tpu.memory_space<vmem>>, vector<1x1x256xf32>
    %384 = vector.shape_cast %383 : vector<1x1x256xf32> to vector<1x256xf32>
    %c1_184 = arith.constant 1 : index
    %c0_185 = arith.constant 0 : index
    %c51_186 = arith.constant 51 : index
    %385 = vector.load %arg7[%c1_184, %c0_185, %c51_186] : memref<2x1x358xf32, #tpu.memory_space<vmem>>, vector<1x1x256xf32>
    %386 = vector.shape_cast %385 : vector<1x1x256xf32> to vector<1x256xf32>
    %c24 = arith.constant 24 : index
    %387 = memref.load %arg5[%c24] : memref<98xf32, #tpu.memory_space<smem>>
    %388 = vector.broadcast %387 : f32 to vector<1x256xf32>
    %389 = arith.mulf %388, %384 : vector<1x256xf32>
    %390 = arith.addf %382, %389 : vector<1x256xf32>
    %c73 = arith.constant 73 : index
    %391 = memref.load %arg5[%c73] : memref<98xf32, #tpu.memory_space<smem>>
    %392 = vector.broadcast %391 : f32 to vector<1x256xf32>
    %393 = arith.mulf %392, %386 : vector<1x256xf32>
    %394 = arith.addf %390, %393 : vector<1x256xf32>
    %c0_187 = arith.constant 0 : index
    %c0_188 = arith.constant 0 : index
    %c67 = arith.constant 67 : index
    %395 = vector.load %arg7[%c0_187, %c0_188, %c67] : memref<2x1x358xf32, #tpu.memory_space<vmem>>, vector<1x1x256xf32>
    %396 = vector.shape_cast %395 : vector<1x1x256xf32> to vector<1x256xf32>
    %c1_189 = arith.constant 1 : index
    %c0_190 = arith.constant 0 : index
    %c67_191 = arith.constant 67 : index
    %397 = vector.load %arg7[%c1_189, %c0_190, %c67_191] : memref<2x1x358xf32, #tpu.memory_space<vmem>>, vector<1x1x256xf32>
    %398 = vector.shape_cast %397 : vector<1x1x256xf32> to vector<1x256xf32>
    %c31 = arith.constant 31 : index
    %399 = memref.load %arg5[%c31] : memref<98xf32, #tpu.memory_space<smem>>
    %400 = vector.broadcast %399 : f32 to vector<1x256xf32>
    %401 = arith.mulf %400, %396 : vector<1x256xf32>
    %402 = arith.addf %394, %401 : vector<1x256xf32>
    %c80_192 = arith.constant 80 : index
    %403 = memref.load %arg5[%c80_192] : memref<98xf32, #tpu.memory_space<smem>>
    %404 = vector.broadcast %403 : f32 to vector<1x256xf32>
    %405 = arith.mulf %404, %398 : vector<1x256xf32>
    %406 = arith.addf %402, %405 : vector<1x256xf32>
    %c0_193 = arith.constant 0 : index
    %c0_194 = arith.constant 0 : index
    %c83 = arith.constant 83 : index
    %407 = vector.load %arg7[%c0_193, %c0_194, %c83] : memref<2x1x358xf32, #tpu.memory_space<vmem>>, vector<1x1x256xf32>
    %408 = vector.shape_cast %407 : vector<1x1x256xf32> to vector<1x256xf32>
    %c1_195 = arith.constant 1 : index
    %c0_196 = arith.constant 0 : index
    %c83_197 = arith.constant 83 : index
    %409 = vector.load %arg7[%c1_195, %c0_196, %c83_197] : memref<2x1x358xf32, #tpu.memory_space<vmem>>, vector<1x1x256xf32>
    %410 = vector.shape_cast %409 : vector<1x1x256xf32> to vector<1x256xf32>
    %c38 = arith.constant 38 : index
    %411 = memref.load %arg5[%c38] : memref<98xf32, #tpu.memory_space<smem>>
    %412 = vector.broadcast %411 : f32 to vector<1x256xf32>
    %413 = arith.mulf %412, %408 : vector<1x256xf32>
    %414 = arith.addf %406, %413 : vector<1x256xf32>
    %c87 = arith.constant 87 : index
    %415 = memref.load %arg5[%c87] : memref<98xf32, #tpu.memory_space<smem>>
    %416 = vector.broadcast %415 : f32 to vector<1x256xf32>
    %417 = arith.mulf %416, %410 : vector<1x256xf32>
    %418 = arith.addf %414, %417 : vector<1x256xf32>
    %c0_198 = arith.constant 0 : index
    %c0_199 = arith.constant 0 : index
    %c99 = arith.constant 99 : index
    %419 = vector.load %arg7[%c0_198, %c0_199, %c99] : memref<2x1x358xf32, #tpu.memory_space<vmem>>, vector<1x1x256xf32>
    %420 = vector.shape_cast %419 : vector<1x1x256xf32> to vector<1x256xf32>
    %c1_200 = arith.constant 1 : index
    %c0_201 = arith.constant 0 : index
    %c99_202 = arith.constant 99 : index
    %421 = vector.load %arg7[%c1_200, %c0_201, %c99_202] : memref<2x1x358xf32, #tpu.memory_space<vmem>>, vector<1x1x256xf32>
    %422 = vector.shape_cast %421 : vector<1x1x256xf32> to vector<1x256xf32>
    %c45 = arith.constant 45 : index
    %423 = memref.load %arg5[%c45] : memref<98xf32, #tpu.memory_space<smem>>
    %424 = vector.broadcast %423 : f32 to vector<1x256xf32>
    %425 = arith.mulf %424, %420 : vector<1x256xf32>
    %426 = arith.addf %418, %425 : vector<1x256xf32>
    %c94 = arith.constant 94 : index
    %427 = memref.load %arg5[%c94] : memref<98xf32, #tpu.memory_space<smem>>
    %428 = vector.broadcast %427 : f32 to vector<1x256xf32>
    %429 = arith.mulf %428, %422 : vector<1x256xf32>
    %430 = arith.addf %426, %429 : vector<1x256xf32>
    %cst_203 = arith.constant 0.000000e+00 : f32
    %431 = vector.broadcast %cst_203 : f32 to vector<1x256xf32>
    %432 = arith.select %345, %430, %431 : vector<1x256xi1>, vector<1x256xf32>
    %433 = arith.addf %336, %432 : vector<1x256xf32>
    %c1_i32 = arith.constant 1 : i32
    %434 = vector.broadcast %c1_i32 : i32 to vector<1x256xi32>
    %435 = arith.addi %44, %434 : vector<1x256xi32>
    %c0_i32_204 = arith.constant 0 : i32
    %436 = vector.broadcast %c0_i32_204 : i32 to vector<1x256xi32>
    %437 = arith.cmpi sge, %435, %436 : vector<1x256xi32>
    %c1_i32_205 = arith.constant 1 : i32
    %438 = vector.broadcast %c1_i32_205 : i32 to vector<1x256xi32>
    %439 = arith.addi %44, %438 : vector<1x256xi32>
    %c16_i32_206 = arith.constant 16 : i32
    %440 = vector.broadcast %c16_i32_206 : i32 to vector<1x256xi32>
    %441 = arith.cmpi slt, %439, %440 : vector<1x256xi32>
    %442 = arith.andi %437, %441 : vector<1x256xi1>
    %cst_207 = arith.constant 0.000000e+00 : f32
    %443 = vector.broadcast %cst_207 : f32 to vector<1x256xf32>
    %c0_208 = arith.constant 0 : index
    %c0_209 = arith.constant 0 : index
    %c4 = arith.constant 4 : index
    %444 = vector.load %arg7[%c0_208, %c0_209, %c4] : memref<2x1x358xf32, #tpu.memory_space<vmem>>, vector<1x1x256xf32>
    %445 = vector.shape_cast %444 : vector<1x1x256xf32> to vector<1x256xf32>
    %c1_210 = arith.constant 1 : index
    %c0_211 = arith.constant 0 : index
    %c4_212 = arith.constant 4 : index
    %446 = vector.load %arg7[%c1_210, %c0_211, %c4_212] : memref<2x1x358xf32, #tpu.memory_space<vmem>>, vector<1x1x256xf32>
    %447 = vector.shape_cast %446 : vector<1x1x256xf32> to vector<1x256xf32>
    %c4_213 = arith.constant 4 : index
    %448 = memref.load %arg5[%c4_213] : memref<98xf32, #tpu.memory_space<smem>>
    %449 = vector.broadcast %448 : f32 to vector<1x256xf32>
    %450 = arith.mulf %449, %445 : vector<1x256xf32>
    %451 = arith.addf %443, %450 : vector<1x256xf32>
    %c53 = arith.constant 53 : index
    %452 = memref.load %arg5[%c53] : memref<98xf32, #tpu.memory_space<smem>>
    %453 = vector.broadcast %452 : f32 to vector<1x256xf32>
    %454 = arith.mulf %453, %447 : vector<1x256xf32>
    %455 = arith.addf %451, %454 : vector<1x256xf32>
    %c0_214 = arith.constant 0 : index
    %c0_215 = arith.constant 0 : index
    %c20 = arith.constant 20 : index
    %456 = vector.load %arg7[%c0_214, %c0_215, %c20] : memref<2x1x358xf32, #tpu.memory_space<vmem>>, vector<1x1x256xf32>
    %457 = vector.shape_cast %456 : vector<1x1x256xf32> to vector<1x256xf32>
    %c1_216 = arith.constant 1 : index
    %c0_217 = arith.constant 0 : index
    %c20_218 = arith.constant 20 : index
    %458 = vector.load %arg7[%c1_216, %c0_217, %c20_218] : memref<2x1x358xf32, #tpu.memory_space<vmem>>, vector<1x1x256xf32>
    %459 = vector.shape_cast %458 : vector<1x1x256xf32> to vector<1x256xf32>
    %c11 = arith.constant 11 : index
    %460 = memref.load %arg5[%c11] : memref<98xf32, #tpu.memory_space<smem>>
    %461 = vector.broadcast %460 : f32 to vector<1x256xf32>
    %462 = arith.mulf %461, %457 : vector<1x256xf32>
    %463 = arith.addf %455, %462 : vector<1x256xf32>
    %c60 = arith.constant 60 : index
    %464 = memref.load %arg5[%c60] : memref<98xf32, #tpu.memory_space<smem>>
    %465 = vector.broadcast %464 : f32 to vector<1x256xf32>
    %466 = arith.mulf %465, %459 : vector<1x256xf32>
    %467 = arith.addf %463, %466 : vector<1x256xf32>
    %c0_219 = arith.constant 0 : index
    %c0_220 = arith.constant 0 : index
    %c36_221 = arith.constant 36 : index
    %468 = vector.load %arg7[%c0_219, %c0_220, %c36_221] : memref<2x1x358xf32, #tpu.memory_space<vmem>>, vector<1x1x256xf32>
    %469 = vector.shape_cast %468 : vector<1x1x256xf32> to vector<1x256xf32>
    %c1_222 = arith.constant 1 : index
    %c0_223 = arith.constant 0 : index
    %c36_224 = arith.constant 36 : index
    %470 = vector.load %arg7[%c1_222, %c0_223, %c36_224] : memref<2x1x358xf32, #tpu.memory_space<vmem>>, vector<1x1x256xf32>
    %471 = vector.shape_cast %470 : vector<1x1x256xf32> to vector<1x256xf32>
    %c18_225 = arith.constant 18 : index
    %472 = memref.load %arg5[%c18_225] : memref<98xf32, #tpu.memory_space<smem>>
    %473 = vector.broadcast %472 : f32 to vector<1x256xf32>
    %474 = arith.mulf %473, %469 : vector<1x256xf32>
    %475 = arith.addf %467, %474 : vector<1x256xf32>
    %c67_226 = arith.constant 67 : index
    %476 = memref.load %arg5[%c67_226] : memref<98xf32, #tpu.memory_space<smem>>
    %477 = vector.broadcast %476 : f32 to vector<1x256xf32>
    %478 = arith.mulf %477, %471 : vector<1x256xf32>
    %479 = arith.addf %475, %478 : vector<1x256xf32>
    %c0_227 = arith.constant 0 : index
    %c0_228 = arith.constant 0 : index
    %c52_229 = arith.constant 52 : index
    %480 = vector.load %arg7[%c0_227, %c0_228, %c52_229] : memref<2x1x358xf32, #tpu.memory_space<vmem>>, vector<1x1x256xf32>
    %481 = vector.shape_cast %480 : vector<1x1x256xf32> to vector<1x256xf32>
    %c1_230 = arith.constant 1 : index
    %c0_231 = arith.constant 0 : index
    %c52_232 = arith.constant 52 : index
    %482 = vector.load %arg7[%c1_230, %c0_231, %c52_232] : memref<2x1x358xf32, #tpu.memory_space<vmem>>, vector<1x1x256xf32>
    %483 = vector.shape_cast %482 : vector<1x1x256xf32> to vector<1x256xf32>
    %c25 = arith.constant 25 : index
    %484 = memref.load %arg5[%c25] : memref<98xf32, #tpu.memory_space<smem>>
    %485 = vector.broadcast %484 : f32 to vector<1x256xf32>
    %486 = arith.mulf %485, %481 : vector<1x256xf32>
    %487 = arith.addf %479, %486 : vector<1x256xf32>
    %c74 = arith.constant 74 : index
    %488 = memref.load %arg5[%c74] : memref<98xf32, #tpu.memory_space<smem>>
    %489 = vector.broadcast %488 : f32 to vector<1x256xf32>
    %490 = arith.mulf %489, %483 : vector<1x256xf32>
    %491 = arith.addf %487, %490 : vector<1x256xf32>
    %c0_233 = arith.constant 0 : index
    %c0_234 = arith.constant 0 : index
    %c68 = arith.constant 68 : index
    %492 = vector.load %arg7[%c0_233, %c0_234, %c68] : memref<2x1x358xf32, #tpu.memory_space<vmem>>, vector<1x1x256xf32>
    %493 = vector.shape_cast %492 : vector<1x1x256xf32> to vector<1x256xf32>
    %c1_235 = arith.constant 1 : index
    %c0_236 = arith.constant 0 : index
    %c68_237 = arith.constant 68 : index
    %494 = vector.load %arg7[%c1_235, %c0_236, %c68_237] : memref<2x1x358xf32, #tpu.memory_space<vmem>>, vector<1x1x256xf32>
    %495 = vector.shape_cast %494 : vector<1x1x256xf32> to vector<1x256xf32>
    %c32_238 = arith.constant 32 : index
    %496 = memref.load %arg5[%c32_238] : memref<98xf32, #tpu.memory_space<smem>>
    %497 = vector.broadcast %496 : f32 to vector<1x256xf32>
    %498 = arith.mulf %497, %493 : vector<1x256xf32>
    %499 = arith.addf %491, %498 : vector<1x256xf32>
    %c81_239 = arith.constant 81 : index
    %500 = memref.load %arg5[%c81_239] : memref<98xf32, #tpu.memory_space<smem>>
    %501 = vector.broadcast %500 : f32 to vector<1x256xf32>
    %502 = arith.mulf %501, %495 : vector<1x256xf32>
    %503 = arith.addf %499, %502 : vector<1x256xf32>
    %c0_240 = arith.constant 0 : index
    %c0_241 = arith.constant 0 : index
    %c84_242 = arith.constant 84 : index
    %504 = vector.load %arg7[%c0_240, %c0_241, %c84_242] : memref<2x1x358xf32, #tpu.memory_space<vmem>>, vector<1x1x256xf32>
    %505 = vector.shape_cast %504 : vector<1x1x256xf32> to vector<1x256xf32>
    %c1_243 = arith.constant 1 : index
    %c0_244 = arith.constant 0 : index
    %c84_245 = arith.constant 84 : index
    %506 = vector.load %arg7[%c1_243, %c0_244, %c84_245] : memref<2x1x358xf32, #tpu.memory_space<vmem>>, vector<1x1x256xf32>
    %507 = vector.shape_cast %506 : vector<1x1x256xf32> to vector<1x256xf32>
    %c39 = arith.constant 39 : index
    %508 = memref.load %arg5[%c39] : memref<98xf32, #tpu.memory_space<smem>>
    %509 = vector.broadcast %508 : f32 to vector<1x256xf32>
    %510 = arith.mulf %509, %505 : vector<1x256xf32>
    %511 = arith.addf %503, %510 : vector<1x256xf32>
    %c88 = arith.constant 88 : index
    %512 = memref.load %arg5[%c88] : memref<98xf32, #tpu.memory_space<smem>>
    %513 = vector.broadcast %512 : f32 to vector<1x256xf32>
    %514 = arith.mulf %513, %507 : vector<1x256xf32>
    %515 = arith.addf %511, %514 : vector<1x256xf32>
    %c0_246 = arith.constant 0 : index
    %c0_247 = arith.constant 0 : index
    %c100 = arith.constant 100 : index
    %516 = vector.load %arg7[%c0_246, %c0_247, %c100] : memref<2x1x358xf32, #tpu.memory_space<vmem>>, vector<1x1x256xf32>
    %517 = vector.shape_cast %516 : vector<1x1x256xf32> to vector<1x256xf32>
    %c1_248 = arith.constant 1 : index
    %c0_249 = arith.constant 0 : index
    %c100_250 = arith.constant 100 : index
    %518 = vector.load %arg7[%c1_248, %c0_249, %c100_250] : memref<2x1x358xf32, #tpu.memory_space<vmem>>, vector<1x1x256xf32>
    %519 = vector.shape_cast %518 : vector<1x1x256xf32> to vector<1x256xf32>
    %c46 = arith.constant 46 : index
    %520 = memref.load %arg5[%c46] : memref<98xf32, #tpu.memory_space<smem>>
    %521 = vector.broadcast %520 : f32 to vector<1x256xf32>
    %522 = arith.mulf %521, %517 : vector<1x256xf32>
    %523 = arith.addf %515, %522 : vector<1x256xf32>
    %c95 = arith.constant 95 : index
    %524 = memref.load %arg5[%c95] : memref<98xf32, #tpu.memory_space<smem>>
    %525 = vector.broadcast %524 : f32 to vector<1x256xf32>
    %526 = arith.mulf %525, %519 : vector<1x256xf32>
    %527 = arith.addf %523, %526 : vector<1x256xf32>
    %cst_251 = arith.constant 0.000000e+00 : f32
    %528 = vector.broadcast %cst_251 : f32 to vector<1x256xf32>
    %529 = arith.select %442, %527, %528 : vector<1x256xi1>, vector<1x256xf32>
    %530 = arith.addf %433, %529 : vector<1x256xf32>
    %c2_i32 = arith.constant 2 : i32
    %531 = vector.broadcast %c2_i32 : i32 to vector<1x256xi32>
    %532 = arith.addi %44, %531 : vector<1x256xi32>
    %c0_i32_252 = arith.constant 0 : i32
    %533 = vector.broadcast %c0_i32_252 : i32 to vector<1x256xi32>
    %534 = arith.cmpi sge, %532, %533 : vector<1x256xi32>
    %c2_i32_253 = arith.constant 2 : i32
    %535 = vector.broadcast %c2_i32_253 : i32 to vector<1x256xi32>
    %536 = arith.addi %44, %535 : vector<1x256xi32>
    %c16_i32_254 = arith.constant 16 : i32
    %537 = vector.broadcast %c16_i32_254 : i32 to vector<1x256xi32>
    %538 = arith.cmpi slt, %536, %537 : vector<1x256xi32>
    %539 = arith.andi %534, %538 : vector<1x256xi1>
    %cst_255 = arith.constant 0.000000e+00 : f32
    %540 = vector.broadcast %cst_255 : f32 to vector<1x256xf32>
    %c0_256 = arith.constant 0 : index
    %c0_257 = arith.constant 0 : index
    %c5 = arith.constant 5 : index
    %541 = vector.load %arg7[%c0_256, %c0_257, %c5] : memref<2x1x358xf32, #tpu.memory_space<vmem>>, vector<1x1x256xf32>
    %542 = vector.shape_cast %541 : vector<1x1x256xf32> to vector<1x256xf32>
    %c1_258 = arith.constant 1 : index
    %c0_259 = arith.constant 0 : index
    %c5_260 = arith.constant 5 : index
    %543 = vector.load %arg7[%c1_258, %c0_259, %c5_260] : memref<2x1x358xf32, #tpu.memory_space<vmem>>, vector<1x1x256xf32>
    %544 = vector.shape_cast %543 : vector<1x1x256xf32> to vector<1x256xf32>
    %c5_261 = arith.constant 5 : index
    %545 = memref.load %arg5[%c5_261] : memref<98xf32, #tpu.memory_space<smem>>
    %546 = vector.broadcast %545 : f32 to vector<1x256xf32>
    %547 = arith.mulf %546, %542 : vector<1x256xf32>
    %548 = arith.addf %540, %547 : vector<1x256xf32>
    %c54 = arith.constant 54 : index
    %549 = memref.load %arg5[%c54] : memref<98xf32, #tpu.memory_space<smem>>
    %550 = vector.broadcast %549 : f32 to vector<1x256xf32>
    %551 = arith.mulf %550, %544 : vector<1x256xf32>
    %552 = arith.addf %548, %551 : vector<1x256xf32>
    %c0_262 = arith.constant 0 : index
    %c0_263 = arith.constant 0 : index
    %c21_264 = arith.constant 21 : index
    %553 = vector.load %arg7[%c0_262, %c0_263, %c21_264] : memref<2x1x358xf32, #tpu.memory_space<vmem>>, vector<1x1x256xf32>
    %554 = vector.shape_cast %553 : vector<1x1x256xf32> to vector<1x256xf32>
    %c1_265 = arith.constant 1 : index
    %c0_266 = arith.constant 0 : index
    %c21_267 = arith.constant 21 : index
    %555 = vector.load %arg7[%c1_265, %c0_266, %c21_267] : memref<2x1x358xf32, #tpu.memory_space<vmem>>, vector<1x1x256xf32>
    %556 = vector.shape_cast %555 : vector<1x1x256xf32> to vector<1x256xf32>
    %c12 = arith.constant 12 : index
    %557 = memref.load %arg5[%c12] : memref<98xf32, #tpu.memory_space<smem>>
    %558 = vector.broadcast %557 : f32 to vector<1x256xf32>
    %559 = arith.mulf %558, %554 : vector<1x256xf32>
    %560 = arith.addf %552, %559 : vector<1x256xf32>
    %c61 = arith.constant 61 : index
    %561 = memref.load %arg5[%c61] : memref<98xf32, #tpu.memory_space<smem>>
    %562 = vector.broadcast %561 : f32 to vector<1x256xf32>
    %563 = arith.mulf %562, %556 : vector<1x256xf32>
    %564 = arith.addf %560, %563 : vector<1x256xf32>
    %c0_268 = arith.constant 0 : index
    %c0_269 = arith.constant 0 : index
    %c37_270 = arith.constant 37 : index
    %565 = vector.load %arg7[%c0_268, %c0_269, %c37_270] : memref<2x1x358xf32, #tpu.memory_space<vmem>>, vector<1x1x256xf32>
    %566 = vector.shape_cast %565 : vector<1x1x256xf32> to vector<1x256xf32>
    %c1_271 = arith.constant 1 : index
    %c0_272 = arith.constant 0 : index
    %c37_273 = arith.constant 37 : index
    %567 = vector.load %arg7[%c1_271, %c0_272, %c37_273] : memref<2x1x358xf32, #tpu.memory_space<vmem>>, vector<1x1x256xf32>
    %568 = vector.shape_cast %567 : vector<1x1x256xf32> to vector<1x256xf32>
    %c19_274 = arith.constant 19 : index
    %569 = memref.load %arg5[%c19_274] : memref<98xf32, #tpu.memory_space<smem>>
    %570 = vector.broadcast %569 : f32 to vector<1x256xf32>
    %571 = arith.mulf %570, %566 : vector<1x256xf32>
    %572 = arith.addf %564, %571 : vector<1x256xf32>
    %c68_275 = arith.constant 68 : index
    %573 = memref.load %arg5[%c68_275] : memref<98xf32, #tpu.memory_space<smem>>
    %574 = vector.broadcast %573 : f32 to vector<1x256xf32>
    %575 = arith.mulf %574, %568 : vector<1x256xf32>
    %576 = arith.addf %572, %575 : vector<1x256xf32>
    %c0_276 = arith.constant 0 : index
    %c0_277 = arith.constant 0 : index
    %c53_278 = arith.constant 53 : index
    %577 = vector.load %arg7[%c0_276, %c0_277, %c53_278] : memref<2x1x358xf32, #tpu.memory_space<vmem>>, vector<1x1x256xf32>
    %578 = vector.shape_cast %577 : vector<1x1x256xf32> to vector<1x256xf32>
    %c1_279 = arith.constant 1 : index
    %c0_280 = arith.constant 0 : index
    %c53_281 = arith.constant 53 : index
    %579 = vector.load %arg7[%c1_279, %c0_280, %c53_281] : memref<2x1x358xf32, #tpu.memory_space<vmem>>, vector<1x1x256xf32>
    %580 = vector.shape_cast %579 : vector<1x1x256xf32> to vector<1x256xf32>
    %c26 = arith.constant 26 : index
    %581 = memref.load %arg5[%c26] : memref<98xf32, #tpu.memory_space<smem>>
    %582 = vector.broadcast %581 : f32 to vector<1x256xf32>
    %583 = arith.mulf %582, %578 : vector<1x256xf32>
    %584 = arith.addf %576, %583 : vector<1x256xf32>
    %c75 = arith.constant 75 : index
    %585 = memref.load %arg5[%c75] : memref<98xf32, #tpu.memory_space<smem>>
    %586 = vector.broadcast %585 : f32 to vector<1x256xf32>
    %587 = arith.mulf %586, %580 : vector<1x256xf32>
    %588 = arith.addf %584, %587 : vector<1x256xf32>
    %c0_282 = arith.constant 0 : index
    %c0_283 = arith.constant 0 : index
    %c69 = arith.constant 69 : index
    %589 = vector.load %arg7[%c0_282, %c0_283, %c69] : memref<2x1x358xf32, #tpu.memory_space<vmem>>, vector<1x1x256xf32>
    %590 = vector.shape_cast %589 : vector<1x1x256xf32> to vector<1x256xf32>
    %c1_284 = arith.constant 1 : index
    %c0_285 = arith.constant 0 : index
    %c69_286 = arith.constant 69 : index
    %591 = vector.load %arg7[%c1_284, %c0_285, %c69_286] : memref<2x1x358xf32, #tpu.memory_space<vmem>>, vector<1x1x256xf32>
    %592 = vector.shape_cast %591 : vector<1x1x256xf32> to vector<1x256xf32>
    %c33_287 = arith.constant 33 : index
    %593 = memref.load %arg5[%c33_287] : memref<98xf32, #tpu.memory_space<smem>>
    %594 = vector.broadcast %593 : f32 to vector<1x256xf32>
    %595 = arith.mulf %594, %590 : vector<1x256xf32>
    %596 = arith.addf %588, %595 : vector<1x256xf32>
    %c82_288 = arith.constant 82 : index
    %597 = memref.load %arg5[%c82_288] : memref<98xf32, #tpu.memory_space<smem>>
    %598 = vector.broadcast %597 : f32 to vector<1x256xf32>
    %599 = arith.mulf %598, %592 : vector<1x256xf32>
    %600 = arith.addf %596, %599 : vector<1x256xf32>
    %c0_289 = arith.constant 0 : index
    %c0_290 = arith.constant 0 : index
    %c85_291 = arith.constant 85 : index
    %601 = vector.load %arg7[%c0_289, %c0_290, %c85_291] : memref<2x1x358xf32, #tpu.memory_space<vmem>>, vector<1x1x256xf32>
    %602 = vector.shape_cast %601 : vector<1x1x256xf32> to vector<1x256xf32>
    %c1_292 = arith.constant 1 : index
    %c0_293 = arith.constant 0 : index
    %c85_294 = arith.constant 85 : index
    %603 = vector.load %arg7[%c1_292, %c0_293, %c85_294] : memref<2x1x358xf32, #tpu.memory_space<vmem>>, vector<1x1x256xf32>
    %604 = vector.shape_cast %603 : vector<1x1x256xf32> to vector<1x256xf32>
    %c40 = arith.constant 40 : index
    %605 = memref.load %arg5[%c40] : memref<98xf32, #tpu.memory_space<smem>>
    %606 = vector.broadcast %605 : f32 to vector<1x256xf32>
    %607 = arith.mulf %606, %602 : vector<1x256xf32>
    %608 = arith.addf %600, %607 : vector<1x256xf32>
    %c89 = arith.constant 89 : index
    %609 = memref.load %arg5[%c89] : memref<98xf32, #tpu.memory_space<smem>>
    %610 = vector.broadcast %609 : f32 to vector<1x256xf32>
    %611 = arith.mulf %610, %604 : vector<1x256xf32>
    %612 = arith.addf %608, %611 : vector<1x256xf32>
    %c0_295 = arith.constant 0 : index
    %c0_296 = arith.constant 0 : index
    %c101 = arith.constant 101 : index
    %613 = vector.load %arg7[%c0_295, %c0_296, %c101] : memref<2x1x358xf32, #tpu.memory_space<vmem>>, vector<1x1x256xf32>
    %614 = vector.shape_cast %613 : vector<1x1x256xf32> to vector<1x256xf32>
    %c1_297 = arith.constant 1 : index
    %c0_298 = arith.constant 0 : index
    %c101_299 = arith.constant 101 : index
    %615 = vector.load %arg7[%c1_297, %c0_298, %c101_299] : memref<2x1x358xf32, #tpu.memory_space<vmem>>, vector<1x1x256xf32>
    %616 = vector.shape_cast %615 : vector<1x1x256xf32> to vector<1x256xf32>
    %c47 = arith.constant 47 : index
    %617 = memref.load %arg5[%c47] : memref<98xf32, #tpu.memory_space<smem>>
    %618 = vector.broadcast %617 : f32 to vector<1x256xf32>
    %619 = arith.mulf %618, %614 : vector<1x256xf32>
    %620 = arith.addf %612, %619 : vector<1x256xf32>
    %c96_300 = arith.constant 96 : index
    %621 = memref.load %arg5[%c96_300] : memref<98xf32, #tpu.memory_space<smem>>
    %622 = vector.broadcast %621 : f32 to vector<1x256xf32>
    %623 = arith.mulf %622, %616 : vector<1x256xf32>
    %624 = arith.addf %620, %623 : vector<1x256xf32>
    %cst_301 = arith.constant 0.000000e+00 : f32
    %625 = vector.broadcast %cst_301 : f32 to vector<1x256xf32>
    %626 = arith.select %539, %624, %625 : vector<1x256xi1>, vector<1x256xf32>
    %627 = arith.addf %530, %626 : vector<1x256xf32>
    %c3_i32 = arith.constant 3 : i32
    %628 = vector.broadcast %c3_i32 : i32 to vector<1x256xi32>
    %629 = arith.addi %44, %628 : vector<1x256xi32>
    %c0_i32_302 = arith.constant 0 : i32
    %630 = vector.broadcast %c0_i32_302 : i32 to vector<1x256xi32>
    %631 = arith.cmpi sge, %629, %630 : vector<1x256xi32>
    %c3_i32_303 = arith.constant 3 : i32
    %632 = vector.broadcast %c3_i32_303 : i32 to vector<1x256xi32>
    %633 = arith.addi %44, %632 : vector<1x256xi32>
    %c16_i32_304 = arith.constant 16 : i32
    %634 = vector.broadcast %c16_i32_304 : i32 to vector<1x256xi32>
    %635 = arith.cmpi slt, %633, %634 : vector<1x256xi32>
    %636 = arith.andi %631, %635 : vector<1x256xi1>
    %cst_305 = arith.constant 0.000000e+00 : f32
    %637 = vector.broadcast %cst_305 : f32 to vector<1x256xf32>
    %c0_306 = arith.constant 0 : index
    %c0_307 = arith.constant 0 : index
    %c6 = arith.constant 6 : index
    %638 = vector.load %arg7[%c0_306, %c0_307, %c6] : memref<2x1x358xf32, #tpu.memory_space<vmem>>, vector<1x1x256xf32>
    %639 = vector.shape_cast %638 : vector<1x1x256xf32> to vector<1x256xf32>
    %c1_308 = arith.constant 1 : index
    %c0_309 = arith.constant 0 : index
    %c6_310 = arith.constant 6 : index
    %640 = vector.load %arg7[%c1_308, %c0_309, %c6_310] : memref<2x1x358xf32, #tpu.memory_space<vmem>>, vector<1x1x256xf32>
    %641 = vector.shape_cast %640 : vector<1x1x256xf32> to vector<1x256xf32>
    %c6_311 = arith.constant 6 : index
    %642 = memref.load %arg5[%c6_311] : memref<98xf32, #tpu.memory_space<smem>>
    %643 = vector.broadcast %642 : f32 to vector<1x256xf32>
    %644 = arith.mulf %643, %639 : vector<1x256xf32>
    %645 = arith.addf %637, %644 : vector<1x256xf32>
    %c55 = arith.constant 55 : index
    %646 = memref.load %arg5[%c55] : memref<98xf32, #tpu.memory_space<smem>>
    %647 = vector.broadcast %646 : f32 to vector<1x256xf32>
    %648 = arith.mulf %647, %641 : vector<1x256xf32>
    %649 = arith.addf %645, %648 : vector<1x256xf32>
    %c0_312 = arith.constant 0 : index
    %c0_313 = arith.constant 0 : index
    %c22_314 = arith.constant 22 : index
    %650 = vector.load %arg7[%c0_312, %c0_313, %c22_314] : memref<2x1x358xf32, #tpu.memory_space<vmem>>, vector<1x1x256xf32>
    %651 = vector.shape_cast %650 : vector<1x1x256xf32> to vector<1x256xf32>
    %c1_315 = arith.constant 1 : index
    %c0_316 = arith.constant 0 : index
    %c22_317 = arith.constant 22 : index
    %652 = vector.load %arg7[%c1_315, %c0_316, %c22_317] : memref<2x1x358xf32, #tpu.memory_space<vmem>>, vector<1x1x256xf32>
    %653 = vector.shape_cast %652 : vector<1x1x256xf32> to vector<1x256xf32>
    %c13 = arith.constant 13 : index
    %654 = memref.load %arg5[%c13] : memref<98xf32, #tpu.memory_space<smem>>
    %655 = vector.broadcast %654 : f32 to vector<1x256xf32>
    %656 = arith.mulf %655, %651 : vector<1x256xf32>
    %657 = arith.addf %649, %656 : vector<1x256xf32>
    %c62 = arith.constant 62 : index
    %658 = memref.load %arg5[%c62] : memref<98xf32, #tpu.memory_space<smem>>
    %659 = vector.broadcast %658 : f32 to vector<1x256xf32>
    %660 = arith.mulf %659, %653 : vector<1x256xf32>
    %661 = arith.addf %657, %660 : vector<1x256xf32>
    %c0_318 = arith.constant 0 : index
    %c0_319 = arith.constant 0 : index
    %c38_320 = arith.constant 38 : index
    %662 = vector.load %arg7[%c0_318, %c0_319, %c38_320] : memref<2x1x358xf32, #tpu.memory_space<vmem>>, vector<1x1x256xf32>
    %663 = vector.shape_cast %662 : vector<1x1x256xf32> to vector<1x256xf32>
    %c1_321 = arith.constant 1 : index
    %c0_322 = arith.constant 0 : index
    %c38_323 = arith.constant 38 : index
    %664 = vector.load %arg7[%c1_321, %c0_322, %c38_323] : memref<2x1x358xf32, #tpu.memory_space<vmem>>, vector<1x1x256xf32>
    %665 = vector.shape_cast %664 : vector<1x1x256xf32> to vector<1x256xf32>
    %c20_324 = arith.constant 20 : index
    %666 = memref.load %arg5[%c20_324] : memref<98xf32, #tpu.memory_space<smem>>
    %667 = vector.broadcast %666 : f32 to vector<1x256xf32>
    %668 = arith.mulf %667, %663 : vector<1x256xf32>
    %669 = arith.addf %661, %668 : vector<1x256xf32>
    %c69_325 = arith.constant 69 : index
    %670 = memref.load %arg5[%c69_325] : memref<98xf32, #tpu.memory_space<smem>>
    %671 = vector.broadcast %670 : f32 to vector<1x256xf32>
    %672 = arith.mulf %671, %665 : vector<1x256xf32>
    %673 = arith.addf %669, %672 : vector<1x256xf32>
    %c0_326 = arith.constant 0 : index
    %c0_327 = arith.constant 0 : index
    %c54_328 = arith.constant 54 : index
    %674 = vector.load %arg7[%c0_326, %c0_327, %c54_328] : memref<2x1x358xf32, #tpu.memory_space<vmem>>, vector<1x1x256xf32>
    %675 = vector.shape_cast %674 : vector<1x1x256xf32> to vector<1x256xf32>
    %c1_329 = arith.constant 1 : index
    %c0_330 = arith.constant 0 : index
    %c54_331 = arith.constant 54 : index
    %676 = vector.load %arg7[%c1_329, %c0_330, %c54_331] : memref<2x1x358xf32, #tpu.memory_space<vmem>>, vector<1x1x256xf32>
    %677 = vector.shape_cast %676 : vector<1x1x256xf32> to vector<1x256xf32>
    %c27 = arith.constant 27 : index
    %678 = memref.load %arg5[%c27] : memref<98xf32, #tpu.memory_space<smem>>
    %679 = vector.broadcast %678 : f32 to vector<1x256xf32>
    %680 = arith.mulf %679, %675 : vector<1x256xf32>
    %681 = arith.addf %673, %680 : vector<1x256xf32>
    %c76 = arith.constant 76 : index
    %682 = memref.load %arg5[%c76] : memref<98xf32, #tpu.memory_space<smem>>
    %683 = vector.broadcast %682 : f32 to vector<1x256xf32>
    %684 = arith.mulf %683, %677 : vector<1x256xf32>
    %685 = arith.addf %681, %684 : vector<1x256xf32>
    %c0_332 = arith.constant 0 : index
    %c0_333 = arith.constant 0 : index
    %c70_334 = arith.constant 70 : index
    %686 = vector.load %arg7[%c0_332, %c0_333, %c70_334] : memref<2x1x358xf32, #tpu.memory_space<vmem>>, vector<1x1x256xf32>
    %687 = vector.shape_cast %686 : vector<1x1x256xf32> to vector<1x256xf32>
    %c1_335 = arith.constant 1 : index
    %c0_336 = arith.constant 0 : index
    %c70_337 = arith.constant 70 : index
    %688 = vector.load %arg7[%c1_335, %c0_336, %c70_337] : memref<2x1x358xf32, #tpu.memory_space<vmem>>, vector<1x1x256xf32>
    %689 = vector.shape_cast %688 : vector<1x1x256xf32> to vector<1x256xf32>
    %c34_338 = arith.constant 34 : index
    %690 = memref.load %arg5[%c34_338] : memref<98xf32, #tpu.memory_space<smem>>
    %691 = vector.broadcast %690 : f32 to vector<1x256xf32>
    %692 = arith.mulf %691, %687 : vector<1x256xf32>
    %693 = arith.addf %685, %692 : vector<1x256xf32>
    %c83_339 = arith.constant 83 : index
    %694 = memref.load %arg5[%c83_339] : memref<98xf32, #tpu.memory_space<smem>>
    %695 = vector.broadcast %694 : f32 to vector<1x256xf32>
    %696 = arith.mulf %695, %689 : vector<1x256xf32>
    %697 = arith.addf %693, %696 : vector<1x256xf32>
    %c0_340 = arith.constant 0 : index
    %c0_341 = arith.constant 0 : index
    %c86_342 = arith.constant 86 : index
    %698 = vector.load %arg7[%c0_340, %c0_341, %c86_342] : memref<2x1x358xf32, #tpu.memory_space<vmem>>, vector<1x1x256xf32>
    %699 = vector.shape_cast %698 : vector<1x1x256xf32> to vector<1x256xf32>
    %c1_343 = arith.constant 1 : index
    %c0_344 = arith.constant 0 : index
    %c86_345 = arith.constant 86 : index
    %700 = vector.load %arg7[%c1_343, %c0_344, %c86_345] : memref<2x1x358xf32, #tpu.memory_space<vmem>>, vector<1x1x256xf32>
    %701 = vector.shape_cast %700 : vector<1x1x256xf32> to vector<1x256xf32>
    %c41 = arith.constant 41 : index
    %702 = memref.load %arg5[%c41] : memref<98xf32, #tpu.memory_space<smem>>
    %703 = vector.broadcast %702 : f32 to vector<1x256xf32>
    %704 = arith.mulf %703, %699 : vector<1x256xf32>
    %705 = arith.addf %697, %704 : vector<1x256xf32>
    %c90 = arith.constant 90 : index
    %706 = memref.load %arg5[%c90] : memref<98xf32, #tpu.memory_space<smem>>
    %707 = vector.broadcast %706 : f32 to vector<1x256xf32>
    %708 = arith.mulf %707, %701 : vector<1x256xf32>
    %709 = arith.addf %705, %708 : vector<1x256xf32>
    %c0_346 = arith.constant 0 : index
    %c0_347 = arith.constant 0 : index
    %c102 = arith.constant 102 : index
    %710 = vector.load %arg7[%c0_346, %c0_347, %c102] : memref<2x1x358xf32, #tpu.memory_space<vmem>>, vector<1x1x256xf32>
    %711 = vector.shape_cast %710 : vector<1x1x256xf32> to vector<1x256xf32>
    %c1_348 = arith.constant 1 : index
    %c0_349 = arith.constant 0 : index
    %c102_350 = arith.constant 102 : index
    %712 = vector.load %arg7[%c1_348, %c0_349, %c102_350] : memref<2x1x358xf32, #tpu.memory_space<vmem>>, vector<1x1x256xf32>
    %713 = vector.shape_cast %712 : vector<1x1x256xf32> to vector<1x256xf32>
    %c48_351 = arith.constant 48 : index
    %714 = memref.load %arg5[%c48_351] : memref<98xf32, #tpu.memory_space<smem>>
    %715 = vector.broadcast %714 : f32 to vector<1x256xf32>
    %716 = arith.mulf %715, %711 : vector<1x256xf32>
    %717 = arith.addf %709, %716 : vector<1x256xf32>
    %c97_352 = arith.constant 97 : index
    %718 = memref.load %arg5[%c97_352] : memref<98xf32, #tpu.memory_space<smem>>
    %719 = vector.broadcast %718 : f32 to vector<1x256xf32>
    %720 = arith.mulf %719, %713 : vector<1x256xf32>
    %721 = arith.addf %717, %720 : vector<1x256xf32>
    %cst_353 = arith.constant 0.000000e+00 : f32
    %722 = vector.broadcast %cst_353 : f32 to vector<1x256xf32>
    %723 = arith.select %636, %721, %722 : vector<1x256xi1>, vector<1x256xf32>
    %724 = arith.addf %627, %723 : vector<1x256xf32>
    %725 = arith.negf %724 : vector<1x256xf32>
    %726 = math.exp %725 : vector<1x256xf32>
    %cst_354 = arith.constant 1.000000e+00 : f32
    %727 = vector.broadcast %cst_354 : f32 to vector<1x256xf32>
    %728 = arith.addf %727, %726 : vector<1x256xf32>
    %729 = arith.divf %727, %728 : vector<1x256xf32>
    %730 = vector.broadcast %31 : vector<8x1xf32> to vector<8x256xf32>
    %731 = arith.mulf %4, %730 : vector<8x256xf32>
    %c0_355 = arith.constant 0 : index
    %c0_356 = arith.constant 0 : index
    %732 = vector.load %arg2[%c0_355, %c0_356] : memref<8x8xbf16, #tpu.memory_space<vmem>>, vector<8x8xbf16>
    %733 = arith.truncf %731 : vector<8x256xf32> to vector<8x256xbf16>
    %cst_357 = arith.constant dense<0.000000e+00> : vector<8x256xf32>
    %734 = tpu.matmul %732, %733, %cst_357 {dimension_numbers = #tpu.dot_dimension_numbers<[1], [0], [0], [1], [0, 0, 1, 1], [], []>} : vector<8x8xbf16>, vector<8x256xbf16>, vector<8x256xf32> -> vector<8x256xf32>
    %cst_358 = arith.constant 1.000000e+00 : f32
    %735 = vector.broadcast %cst_358 : f32 to vector<1x256xf32>
    %736 = arith.addf %735, %729 : vector<1x256xf32>
    %737 = vector.broadcast %736 : vector<1x256xf32> to vector<8x256xf32>
    %738 = arith.mulf %4, %737 : vector<8x256xf32>
    %739 = arith.addf %738, %734 : vector<8x256xf32>
    %c0_359 = arith.constant 0 : index
    %c0_360 = arith.constant 0 : index
    %c0_361 = arith.constant 0 : index
    %740 = vector.load %arg6[%c0_359, %c0_360, %c0_361] : memref<1x8x256xf32, #tpu.memory_space<vmem>>, vector<1x8x256xf32>
    %741 = vector.shape_cast %740 : vector<1x8x256xf32> to vector<8x256xf32>
    %742 = vector.shape_cast %739 : vector<8x256xf32> to vector<1x8x256xf32>
    tpu.vector_store %arg6[%c0_359, %c0_360, %c0_361], %742 {strides = array<i32>} : memref<1x8x256xf32, #tpu.memory_space<vmem>>, vector<1x8x256xf32>,
    return
  }
  func.func @transform_0(%arg0: i32) -> (i32, i32, i32) {
    %c0_i32 = arith.constant 0 : i32
    %c0_i32_0 = arith.constant 0 : i32
    %c0_i32_1 = arith.constant 0 : i32
    return %arg0, %c0_i32, %c0_i32_0 : i32, i32, i32
  }
  func.func @transform_1(%arg0: i32) -> (i32, i32) {
    %c0_i32 = arith.constant 0 : i32
    %c0_i32_0 = arith.constant 0 : i32
    %c0_i32_1 = arith.constant 0 : i32
    return %c0_i32, %c0_i32_0 : i32, i32
  }
  func.func @transform_2(%arg0: i32) -> (i32, i32) {
    %c0_i32 = arith.constant 0 : i32
    %c0_i32_0 = arith.constant 0 : i32
    %c0_i32_1 = arith.constant 0 : i32
    return %c0_i32, %c0_i32_0 : i32, i32
  }
  func.func @transform_3(%arg0: i32) -> i32 {
    %c0_i32 = arith.constant 0 : i32
    %c0_i32_0 = arith.constant 0 : i32
    return %c0_i32 : i32
  }
  func.func @transform_4(%arg0: i32) -> i32 {
    %c0_i32 = arith.constant 0 : i32
    %c0_i32_0 = arith.constant 0 : i32
    return %c0_i32 : i32
  }
  func.func @transform_5(%arg0: i32) -> (i32, i32, i32) {
    %c0_i32 = arith.constant 0 : i32
    %c0_i32_0 = arith.constant 0 : i32
    %c0_i32_1 = arith.constant 0 : i32
    return %arg0, %c0_i32, %c0_i32_0 : i32, i32, i32
  }
}

</mosaic_0001>

<bundles_post_ra>
// kernel: d3block_pallas.1
= control target key start
LH: loop header
LB: loop body
LE: loop exit
PB: predicated region body
PF: predicated region fallthrough
CT: control target
= control target key end

     0   :  { %10 = vsyncpa [#allocation5], 0  ;;  %s2483_s0 = inlined_call_operand.vmem [shape: f32[2,8,256], index: 0, kind: input, shape index: {}]   ;;  %s2484_s1 = inlined_call_operand.vmem [shape: bf16[8,8], index: 1, kind: input, shape index: {}]   ;;  %s2485_s2 = inlined_call_operand.vmem [shape: s32[1,256], index: 2, kind: input, shape index: {}]   ;;  %s2486_s3 = inlined_call_operand.vmem [shape: f32[3], index: 3, kind: input, shape index: {}]   ;;  %s2487_s4 = inlined_call_operand.vmem [shape: f32[98], index: 4, kind: input, shape index: {}]   ;;  %s2488_s5 = inlined_call_operand.vmem [shape: f32[2,8,256], index: 5, kind: output, shape index: {}]  }
   0x1   :  { %11 = vsyncpa [#allocation7], 0  ;;  %s1804_s18 = smov 0  }
   0x2 LB: > { %s1524_s19 = sadd.s32 4294967295, %s1753_s18   ;;  %p1526_p0 = scmp.ge.s32.totalorder %s1753_s18, 1  ;;  %s1753_s18 = sphi %s1804_s18, %s17_s18  }
   0x3   : > { %p158_p1 = scmp.lt.s32.totalorder %s1753_s18, 3  ;;  %p1527_p2 = scmp.ne.s32.totalorder %s1524_s19, 0 }
   0x4   : > { %s176_s22 = sshll.u32 %s2486_s3, 4  ;;  %p1660_p4 = scmp.eq.s32.totalorder %s1524_s19, 0  ;;  %s177_s22 = int_to_ptr.vmem [resolvable:$true] %s176_s22 }
   0x5   : > { %p159_p3 = pnand %p1526_p0, %p158_p1  ;;  %s186_s25 = sshll.u32 %s2487_s4, 4  ;;  %s187_s25 = int_to_ptr.vmem [resolvable:$true] %s186_s25 }
   0x6   : > { %s1755_s26 = smov [#allocation4]   ;;  %s1756_s27 = smov [#allocation6]  }
   0x7   : > { %p1653_p5 = pneg %p159_p3 }
   0x8   : > { %207 = sbr.rel (%p159_p3) target bundleno = 678 (0x2a6), region = 40 }
   0x9   : > { %p1654_p6 = pnand %p1660_p4, %p1653_p5 }
   0xb   : > { %1656 = dma.vmem_to_smem (!%p1654_p6), %s177_s22, 16, %s1755_s26, [#allocation5]  }
   0xc   : > { %1659 = dma.vmem_to_smem (!%p1654_p6), %s187_s25, 16, %s1756_s27, [#allocation7]  }
   0xd   : > { %1744 = dma.done.wait (%p1660_p4), [#allocation5], 16  }
   0xe   : > { %1746 = vsyncadd (%p1660_p4), [#allocation5], 4294967280 }
   0xf   : > { %1748 = dma.done.wait (%p1660_p4), [#allocation7], 16  }
  0x10   : > { %1750 = vsyncadd (%p1660_p4), [#allocation7], 4294967280 }
  0x11   : > { %219 = sfence }
  0x12   : > { %p242_p7 = scmp.lt.s32.totalorder %s1524_s19, 1 }
  0x13   : > { %256 = sbr.rel (%p1527_p2) target bundleno = 29 (0x1d), region = 52 }
  0x14   : > { %s243_s28 = scalar_select %p242_p7, %s1524_s19, 1 }
  0x16   : > { %s1643_s29 = sshll.u32 %s243_s28, 4 }
  0x17   : > { %s1826_s7 = scalar_lea.vmem %s2483_s0, %s1643_s29  ;;  %s1831_s10 = scalar_lea.vmem %s2488_s5, %s1643_s29 }
  0x18   : > { %v257_v0 = vlaneseq  ;;  %vm263_vm0 = vcmask 7168   ;;  %vm265_vm1 = vcmask 1024   ;;  %v1757_v1 = vmov 0.0  }
  0x19   : > { %264 = vst.msk [vmem:[#allocation3] sm:$0xff] %vm263_vm0, %v1757_v1 }
  0x1a   : > { %vm259_vm2 = vcmp.lt.s32.totalorder %v257_v0, 358  ;;  %266 = vst.msk [vmem:[#allocation3 + $0x8] sm:$0x3] %vm265_vm1, %v1757_v1 }
  0x1b   : > { %261 = vst.msk [vmem:[#allocation2] sm:$0x7] %vm259_vm2, %v1757_v1 }
  0x1c   : > { %262 = vst.msk [vmem:[#allocation2 + $0x3] sm:$0x7] %vm259_vm2, %v1757_v1 }
  0x1d PF: > { %v267_v2 = vld [vmem:[%s1826_s7] sm:$0xff]  ;;  %v268_v3 = vld [vmem:[%s1826_s7 + $0x8] sm:$0xff]  ;;  %v1758_v6 = vmov 8.0   ;;  %vm343_vm3 = vcmask 1040384   ;;  %s1759_s11 = smov 51   ;;  %v351_v41 = vlaneseq  ;;  %s1836_s12 = sld [smem:[#allocation6 + $0x38]] }
  0x1e   : > { %v319_v4 = vrot.slane %v267_v2, 4  ;;  %v325_v5 = vrot.slane %v268_v3, 4  ;;  %1693 = vrcp.f32 %v1758_v6  ;;  %v269_v7 = vadd.f32 %v268_v3, %v267_v2  ;;  %s1838_s13 = sld [smem:[#allocation6 + $0x3f]]  ;;  %s1760_s6 = smov 112  }
  0x1f   : > { %v280_v16 = vmax.f32 %v267_v2, %v268_v3  ;;  %vm1840_vm5 = vcmp.ge.s32.totalorder %v351_v41, 51  ;;  %vm1844_vm6 = vcmp.lt.s32.totalorder %v351_v41, 307  ;;  %s1551_s14 = sld [smem:[#allocation6 + $0x54]]  ;;  %vm348_vm7 = vcmask 416768   ;;  %s1761_s8 = smov 96  }
  0x20   : > { %v357_v8 = vmax.f32 %v267_v2, %v319_v4  ;;  %v363_v9 = vmax.f32 %v268_v3, %v325_v5  ;;  %v320_v10 = vadd.f32 %v319_v4, %v267_v2  ;;  %v326_v11 = vadd.f32 %v325_v5, %v268_v3  ;;  %270 = vadd.xlane.f32.xlu0 %v269_v7  ;;  %s1848_s15 = sld [smem:[#allocation6 + $0x5b]]  ;;  %vm354_vm8 = vmand %vm1840_vm5, %vm1844_vm6 }
  0x21   : > { %s1850_s16 = sld [smem:[#allocation6 + $0x46]]  ;;  %vm284_vm10 = vcmask 7168   ;;  %vm403_vm14 = vcmask 916480   ;;  %vm424_vm0 = vcmask 785408   ;;  %vm445_vm1 = vcmask 654336  }
  0x22   : > { %v358_v12 = vrot.slane %v357_v8, 2  ;;  %v364_v13 = vrot.slane %v363_v9, 2  ;;  %v321_v14 = vrot.slane %v320_v10, 2  ;;  %v327_v15 = vrot.slane %v326_v11, 2  ;;  %s1856_s17 = sld [smem:[#allocation6 + $0x40]] }
  0x23   : > { %s1858_s19 = sld [smem:[#allocation6 + $0x47]]  ;;  %v408_v49 = vstv %s1836_s12  ;;  %vm466_vm2 = vcmask 523264   ;;  %vm1402_vm5 = vcmask 1043456   ;;  %vm1398_vm6 = vcmask 64512  }
  0x24   : > { %v1694_v17 = vpop.eup %1693  ;;  %v359_v18 = vmax.f32 %v357_v8, %v358_v12  ;;  %v365_v19 = vmax.f32 %v363_v9, %v364_v13  ;;  %v322_v20 = vadd.f32 %v321_v14, %v320_v10  ;;  %v328_v21 = vadd.f32 %v327_v15, %v326_v11  ;;  %s1861_s20 = sld [smem:[#allocation6 + $0x4d]] }
  0x25   : > { %v332_v22 = vmul.f32 8.0, %v1694_v17  ;;  %vm336_vm4 = vweird.f32 %v1694_v17  ;;  %s1868_s21 = sld [smem:[#allocation6 + $0x1]]  ;;  %v429_v50 = vstv %s1838_s13  ;;  %v492_v51 = vstv %s1551_s14  ;;  %s1763_s14 = smov 32  }
  0x26   : > { %v360_v23 = vrot.slane %v359_v18, 1  ;;  %v366_v24 = vrot.slane %v365_v19, 1  ;;  %v323_v25 = vrot.slane %v322_v20, 1  ;;  %v329_v26 = vrot.slane %v328_v21, 1  ;;  %s1870_s22 = sld [smem:[#allocation6 + $0x32]] }
  0x27   : > { %v333_v27 = vsub.f32 1.0, %v332_v22  ;;  %s1872_s23 = sld [smem:[#allocation6 + $0x3]]  ;;  %v513_v57 = vstv %s1848_s15  ;;  %v450_v58 = vstv %s1850_s16  ;;  %s1764_s15 = smov 80  }
  0x28   : > { %v361_v28 = vmax.f32 %v359_v18, %v360_v23  ;;  %v367_v29 = vmax.f32 %v365_v19, %v366_v24  ;;  %281 = vmax.xlane.f32.xlu0 %v280_v16  ;;  %v324_v32 = vadd.f32 %v323_v25, %v322_v20  ;;  %v330_v33 = vadd.f32 %v329_v26, %v328_v21  ;;  %s1874_s24 = sld [smem:[#allocation6 + $0x34]] }
  0x29   : > { %v334_v30 = vmul.f32 %v1694_v17, %v333_v27  ;;  %s1876_s25 = sld [smem:[#allocation6 + $0x4]]  ;;  %v567_v60 = vstv %s1856_s17  ;;  %v587_v61 = vstv %s1858_s19 }
  0x2a   : > { %v370_v31 = vrot.slane %v367_v29, 7  ;;  %s1880_s26 = sld [smem:[#allocation6 + $0x35]]  ;;  %v471_v18 = vstv %s1861_s20  ;;  %s1765_s20 = smov 64  }
  0x2b   : > { %v335_v34 = vadd.f32 %v1694_v17, %v334_v30  ;;  %s1882_s27 = sld [smem:[#allocation6 + $0x33]]  ;;  %v529_v59 = vstv %s1868_s21 }
  0x2c   : > { %v371_v35 = vsel %vm343_vm3, %v361_v28, %v370_v31  ;;  %s1887_s28 = sld [smem:[#allocation6 + $0x36]]  ;;  %v533_v62 = vstv %s1870_s22 }
  0x2d   : > { %372 = vrot.lane.b32.xlu1 %v371_v35, %s1759_s11  ;;  %v337_v36 = vsel %vm336_vm4, %v1694_v17, %v335_v34  ;;  %s1897_s29 = sld [smem:[#allocation6 + $0x2]]  ;;  %v810_v7 = vstv %s1872_s23  ;;  %vm508_vm4 = vcmask 261120  }
  0x2e   : > { %v338_v37 = vmul.f32 %v337_v36, %v324_v32  ;;  %v339_v38 = vmul.f32 %v337_v36, %v330_v33  ;;  %s1899_s30 = sld [smem:[#allocation6 + $0x37]]  ;;  %v814_v0 = vstv %s1874_s24 }
  0x2f   : > { %s1903_s9 = sld [smem:[#allocation6 + $0x5]]  ;;  %v951_v10 = vstv %s1876_s25 }
  0x30   : > { %v342_v39 = vrot.slane %v339_v38, 7  ;;  %s1906_s12 = sld [smem:[#allocation6 + $0x6]]  ;;  %v955_v1 = vstv %s1880_s26 }
  0x31   : > { %s1908_s13 = sld [smem:[#allocation6 + $0x55]]  ;;  %v674_v2 = vstv %s1882_s27 }
  0x32   : > { %v344_v40 = vsel %vm343_vm3, %v338_v37, %v342_v39  ;;  %v1096_v3 = vstv %s1887_s28  ;;  %s1567_s16 = sld [smem:[#allocation6 + $0x5c]]  ;;  %vm487_vm3 = vcmask 392192  }
  0x33   : > { %v670_v12 = vstv %s1897_s29  ;;  %s1557_s17 = sld [smem:[#allocation6 + $0x39]] }
  0x34   : > { %v1237_v11 = vstv %s1899_s30  ;;  %s1575_s19 = sld [smem:[#allocation6 + $0x48]] }
  0x35   : > { %345 = vrot.lane.b32.xlu1 %v344_v40, %s1759_s11  ;;  %s1762_s11 = smov 48   ;;  %v1092_v13 = vstv %s1903_s9  ;;  %s1571_s21 = sld [smem:[#allocation6 + $0x3a]] }
  0x36   : > { %v1233_v17 = vstv %s1906_s12  ;;  %s1563_s22 = sld [smem:[#allocation6 + $0x4e]] }
  0x37   : > { %v627_v19 = vstv %s1908_s13  ;;  %s1577_s23 = sld [smem:[#allocation6 + $0x4f]] }
  0x38   : > { %v647_v36 = vstv %s1567_s16  ;;  %s1579_s24 = sld [smem:[#allocation6 + $0x56]] }
  0x39   : > { %v547_v37 = vstv %s1557_s17  ;;  %s1573_s25 = sld [smem:[#allocation6 + $0x41]] }
  0x3a   : > { %v728_v38 = vstv %s1575_s19  ;;  %s1587_s26 = sld [smem:[#allocation6 + $0x42]] }
  0x3b   : > { %v688_v42 = vstv %s1571_s21  ;;  %s1613_s27 = sld [smem:[#allocation6 + $0x3d]] }
  0x3c   : > { %v607_v43 = vstv %s1563_s22  ;;  %s1544_s28 = sld [smem:[#allocation6 + $0xe]] }
  0x3d   : > { %s1581_s29 = sld [smem:[#allocation6 + $0x5d]] }
  0x3e   : > { %s1601_s30 = sld [smem:[#allocation6 + $0x43]] }
  0x3f   : > { %s1556_s9 = sld [smem:[#allocation6 + $0x8]] }
  0x40   : > { %s1585_s12 = sld [smem:[#allocation6 + $0x3b]] }
  0x41   : > { %s1542_s13 = sld [smem:[#allocation6 + $0x7]] }
  0x42   : > { %s1562_s16 = sld [smem:[#allocation6 + $0x1d]] }
  0x43   : > { %s1599_s17 = sld [smem:[#allocation6 + $0x3c]] }
  0x44   : > { %s1552_s19 = sld [smem:[#allocation6 + $0x2a]] }
  0x45   : > { %s1546_s21 = sld [smem:[#allocation6 + $0x15]] }
  0x46   : > { %s1572_s22 = sld [smem:[#allocation6 + $0x10]] }
  0x9f   : > { %v373_v44 = vpop.permute.xlu1 %372 }
  0xa0   : > { %v374_v45 = vrot.slane %v373_v44, 7 }
  0xa2   : > { %v375_v46 = vsel %vm348_vm7, %v374_v45, %v373_v44  ;;  %v748_v44 = vstv %s1577_s23  ;;  %s1560_s23 = sld [smem:[#allocation6 + $0x16]] }
  0xa3   : > { %378 = vst.msk [vmem:[#allocation2 + $0x3] sm:$0x7] %vm354_vm8, %v375_v46 }
  0xa7   : > { %v346_v47 = vpop.permute.xlu1 %345 }
  0xa8   : > { %v347_v48 = vrot.slane %v346_v47, 7 }
  0xaa   : > { %v1884_v52 = vld [vmem:[#allocation2 + $0x3] sm:$0x7]  ;;  %v349_v53 = vsel %vm348_vm7, %v347_v48, %v346_v47  ;;  %v768_v48 = vstv %s1579_s24  ;;  %s1548_s24 = sld [smem:[#allocation6 + $0x1c]] }
  0xab   : > { %355 = vst.msk [vmem:[#allocation2] sm:$0x7] %vm354_vm8, %v349_v53  ;;  %v409_v54 = vmul.f32 %v408_v49, %v1884_v52  ;;  %v430_v55 = vmul.f32 %v429_v50, %v1884_v52  ;;  %v493_v56 = vmul.f32 %v492_v51, %v1884_v52  ;;  %v514_v4 = vmul.f32 %v513_v57, %v1884_v52 }
  0xac   : > { %v451_v5 = vmul.f32 %v450_v58, %v1884_v52  ;;  %v568_v8 = vmul.f32 %v567_v60, %v1884_v52  ;;  %v534_v9 = vmul.f32 %v533_v62, %v1884_v52  ;;  %v815_v16 = vmul.f32 %v814_v0, %v1884_v52 }
  0xad   : > { %411 = vrot.lane.b32.xlu2 %v409_v54, %s1760_s6  ;;  %432 = vrot.lane.b32.xlu1 %v430_v55, %s1761_s8  ;;  %v956_v21 = vmul.f32 %v955_v1, %v1884_v52  ;;  %v675_v24 = vmul.f32 %v674_v2, %v1884_v52  ;;  %v1097_v27 = vmul.f32 %v1096_v3, %v1884_v52  ;;  %v708_v49 = vstv %s1573_s25  ;;  %s1580_s25 = sld [smem:[#allocation6 + $0x2c]] }
  0xae   : > { %495 = vrot.lane.b32.xlu0 %v493_v56, %s1762_s11  ;;  %v1238_v29 = vmul.f32 %v1237_v11, %v1884_v52  ;;  %v588_v31 = vmul.f32 %v587_v61, %v1884_v52  ;;  %v472_v32 = vmul.f32 %v471_v18, %v1884_v52  ;;  %v628_v35 = vmul.f32 %v627_v19, %v1884_v52  ;;  %v271_v11 = vpop.xlane.xlu0 %270 }
  0xaf   : > { %v648_v39 = vmul.f32 %v647_v36, %v1884_v52  ;;  %v548_v40 = vmul.f32 %v547_v37, %v1884_v52  ;;  %v729_v41 = vmul.f32 %v728_v38, %v1884_v52  ;;  %v689_v45 = vmul.f32 %v688_v42, %v1884_v52 }
  0xb0   : > { %v608_v46 = vmul.f32 %v607_v43, %v1884_v52  ;;  %v749_v47 = vmul.f32 %v748_v44, %v1884_v52  ;;  %v848_v50 = vstv %s1587_s26  ;;  %v769_v51 = vmul.f32 %v768_v48, %v1884_v52  ;;  %s1566_s26 = sld [smem:[#allocation6 + $0x2b]] }
  0xb1   : > { %v709_v53 = vmul.f32 %v708_v49, %v1884_v52  ;;  %v849_v54 = vmul.f32 %v848_v50, %v1884_v52  ;;  %v418_v55 = vstv %s1544_s28  ;;  %v1110_v56 = vstv %s1613_s27  ;;  %s1550_s27 = sld [smem:[#allocation6 + $0x23]] }
  0xb2   : > { %v1916_v63 = vld [vmem:[#allocation2] sm:$0x7]  ;;  %v788_v57 = vstv %s1581_s29  ;;  %v537_v61 = vstv %s1556_s9  ;;  %v989_v62 = vstv %s1601_s30  ;;  %v828_v0 = vstv %s1585_s12  ;;  %s1584_s28 = sld [smem:[#allocation6 + $0xa]] }
  0xb3   : > { %v530_v6 = vmul.f32 %v529_v59, %v1916_v63  ;;  %v811_v15 = vmul.f32 %v810_v7, %v1916_v63  ;;  %v952_v20 = vmul.f32 %v951_v10, %v1916_v63  ;;  %v671_v23 = vmul.f32 %v670_v12, %v1916_v63  ;;  %s1570_s29 = sld [smem:[#allocation6 + $0x9]] }
  0xb4   : > { %v1093_v25 = vmul.f32 %v1092_v13, %v1916_v63  ;;  %v1234_v28 = vmul.f32 %v1233_v17, %v1916_v63  ;;  %v419_v58 = vmul.f32 %v418_v55, %v1916_v63  ;;  %v1111_v59 = vmul.f32 %v1110_v56, %v1884_v52  ;;  %s1558_s30 = sld [smem:[#allocation6 + $0xf]] }
  0xb5   : > { %516 = vrot.lane.b32.xlu2 %v514_v4, %s1763_s14  ;;  %453 = vrot.lane.b32.xlu1 %v451_v5, %s1764_s15  ;;  %v1935_v14 = vadd.f32 %v534_v9, %v530_v6  ;;  %v1944_v22 = vadd.f32 %v815_v16, %v811_v15  ;;  %v1949_v26 = vadd.f32 %v956_v21, %v952_v20  ;;  %v397_v4 = vstv %s1542_s13  ;;  %s1586_s9 = sld [smem:[#allocation6 + $0x11]] }
  0xb6   : > { %570 = vrot.lane.b32.xlu0 %v568_v8, %s1761_s8  ;;  %v1954_v30 = vadd.f32 %v675_v24, %v671_v23  ;;  %v1958_v33 = vadd.f32 %v1097_v27, %v1093_v25  ;;  %v1960_v34 = vadd.f32 %v1238_v29, %v1234_v28  ;;  %v789_v60 = vmul.f32 %v788_v57, %v1884_v52  ;;  %v282_v29 = vpop.xlane.xlu0 %281  ;;  %s1576_s12 = sld [smem:[#allocation6 + $0x1e]] }
  0xb7   : > { %v538_v1 = vmul.f32 %v537_v61, %v1916_v63  ;;  %v990_v2 = vmul.f32 %v989_v62, %v1884_v52  ;;  %v829_v3 = vmul.f32 %v828_v0, %v1884_v52  ;;  %v597_v5 = vstv %s1562_s16  ;;  %s1564_s13 = sld [smem:[#allocation6 + $0x24]] }
  0xb8   : > { %v969_v6 = vstv %s1599_s17  ;;  %v398_v7 = vmul.f32 %v397_v4, %v1916_v63  ;;  %v1766_v8 = vmov 256.0   ;;  %v598_v9 = vmul.f32 %v597_v5, %v1916_v63  ;;  %s286_s16 = sld [smem:[#allocation4]] }
  0xb9   : > { %1695 = vrcp.f32 %v1766_v8  ;;  %v970_v10 = vmul.f32 %v969_v6, %v1884_v52  ;;  %v502_v13 = vstv %s1552_s19  ;;  %v439_v15 = vstv %s1546_s21  ;;  %s1538_s17 = sld [smem:[#allocation4 + $0x1]] }
  0xba   : > { %v698_v17 = vstv %s1572_s22  ;;  %v503_v19 = vmul.f32 %v502_v13, %v1916_v63  ;;  %v440_v20 = vmul.f32 %v439_v15, %v1916_v63  ;;  %v577_v25 = vstv %s1560_s23  ;;  %s1626_s19 = sld [smem:[#allocation6 + $0xd]] }
  0xbb   : > { %v699_v21 = vmul.f32 %v698_v17, %v1916_v63  ;;  %v460_v27 = vstv %s1548_s24  ;;  %v838_v48 = vstv %s1586_s9  ;;  %s1539_s21 = sld [smem:[#allocation4 + $0x2]] }
  0xbc   : > { %v461_v36 = vmul.f32 %v460_v27, %v1916_v63  ;;  %s1578_s22 = sld [smem:[#allocation6 + $0x25]] }
  0xbd   : > { %590 = vrot.lane.b32.xlu2 %v588_v31, %s1764_s15  ;;  %474 = vrot.lane.b32.xlu1 %v472_v32, %s1765_s20  ;;  %v778_v31 = vstv %s1580_s25  ;;  %v617_v55 = vstv %s1564_s13  ;;  %s1574_s23 = sld [smem:[#allocation6 + $0x17]] }
  0xbe   : > { %630 = vrot.lane.b32.xlu0 %v628_v35, %s1762_s11  ;;  %v578_v35 = vmul.f32 %v577_v25, %v1916_v63  ;;  %v779_v38 = vmul.f32 %v778_v31, %v1916_v63  ;;  %v288_v57 = vstv %s286_s16  ;;  %s1614_s24 = sld [smem:[#allocation6 + $0x13]]  ;;  %v618_v62 = vmul.f32 %v617_v55, %v1916_v63 }
  0xbf   : > { %v1696_v12 = vpop.eup %1695  ;;  %s1600_s25 = sld [smem:[#allocation6 + $0x12]] }
  0xc0   : > { %v273_v16 = vmul.f32 256.0, %v1696_v12  ;;  %vm277_vm9 = vweird.f32 %v1696_v12  ;;  %s1627_s9 = sld [smem:[#allocation6 + $0x3e]] }
  0xc1   : > { %v297_v4 = vstv %s1539_s21  ;;  %s1629_s13 = sld [smem:[#allocation6 + $0x45]] }
  0xc2   : > { %v274_v18 = vsub.f32 1.0, %v273_v16  ;;  %v758_v8 = vstv %s1578_s22  ;;  %s1615_s16 = sld [smem:[#allocation6 + $0x44]] }
  0xc3   : > { %s1603_s21 = sld [smem:[#allocation6 + $0x4a]] }
  0xc4   : > { %v275_v23 = vmul.f32 %v1696_v12, %v274_v18  ;;  %s1616_s22 = sld [smem:[#allocation6 + $0x1a]] }
  0xc5   : > { %650 = vrot.lane.b32.xlu2 %v648_v39, %s1763_s14  ;;  %550 = vrot.lane.b32.xlu1 %v548_v40, %s1760_s6  ;;  %v637_v39 = vstv %s1566_s26  ;;  %v481_v40 = vstv %s1550_s27  ;;  %s1598_s26 = sld [smem:[#allocation6 + $0xb]] }
  0xc6   : > { %731 = vrot.lane.b32.xlu0 %v729_v41, %s1764_s15  ;;  %v276_v24 = vadd.f32 %v1696_v12, %v275_v23  ;;  %v818_v41 = vstv %s1584_s28  ;;  %v638_v42 = vmul.f32 %v637_v39, %v1916_v63  ;;  %v482_v43 = vmul.f32 %v481_v40, %v1916_v63  ;;  %s1602_s27 = sld [smem:[#allocation6 + $0x19]] }
  0xc7   : > { %v819_v44 = vmul.f32 %v818_v41, %v1916_v63  ;;  %s1588_s28 = sld [smem:[#allocation6 + $0x18]]  ;;  %v1767_v41 = vmov 0  }
  0xc8   : > { %v278_v28 = vsel %vm277_vm9, %v1696_v12, %v276_v24  ;;  %1691 = vset.pattern.permute.xlu2 %v1767_v41  ;;  %1692 = vset.pattern.permute.xlu0 %v1767_v41  ;;  %vm660_vm9 = vcmask 1039360  }
  0xc9   : > { %v279_v32 = vmul.f32 %v278_v28, %v271_v11  ;;  %v759_v11 = vmul.f32 %v758_v8, %v1916_v63  ;;  %v1009_v8 = vstv %s1603_s21  ;;  %s2209_s21 = sld [smem:[#allocation6 + $0x5f]] }
  0xcb   : > { %v283_v37 = vadd.f32 %v282_v29, %v279_v32 }
  0xcc   : > { %v999_v23 = vstv %s1602_s27  ;;  %s2140_s27 = sld [smem:[#allocation6 + $0x20]] }
  0xcd   : > { %691 = vrot.lane.b32.xlu2 %v689_v45, %s1760_s6  ;;  %610 = vrot.lane.b32.xlu1 %v608_v46, %s1765_s20  ;;  %285 = vst.msk [vmem:[#allocation3 + $0x1] sm:$0xff] %vm284_vm10, %v283_v37  ;;  %v678_v46 = vstv %s1570_s29  ;;  %s1612_s29 = sld [smem:[#allocation6 + $0xc]]  ;;  %v1000_v27 = vmul.f32 %v999_v23, %v1916_v63  ;;  %v858_v32 = vstv %s1588_s28 }
  0xce   : > { %751 = vrot.lane.b32.xlu0 %v749_v47, %s1765_s20  ;;  %v557_v47 = vstv %s1558_s30  ;;  %v679_v49 = vmul.f32 %v678_v46, %v1916_v63  ;;  %s1590_s30 = sld [smem:[#allocation6 + $0x1f]] }
  0xcf   : > { %v558_v50 = vmul.f32 %v557_v47, %v1916_v63  ;;  %v1251_v47 = vstv %s1627_s9  ;;  %s1632_s28 = sld [smem:[#allocation6 + $0x22]] }
  0xd0   : > { %s2161_s9 = sld [smem:[#allocation6 + $0x28]] }
  0xd4   : > { %v287_v56 = vld [vmem:[#allocation3] sm:$0xff]  ;;  %v878_v37 = vstv %s1590_s30  ;;  %s2158_s30 = sld [smem:[#allocation6 + $0x26]] }
  0xd5   : > { %771 = vrot.lane.b32.xlu2 %v769_v51, %s1762_s11  ;;  %711 = vrot.lane.b32.xlu1 %v709_v53, %s1761_s8  ;;  %v839_v51 = vmul.f32 %v838_v48, %v1916_v63  ;;  %v289_v0 = vmul.f32 %v288_v57, %v287_v56  ;;  %v879_v40 = vmul.f32 %v878_v37, %v1916_v63 }
  0xd6   : > { %851 = vrot.lane.b32.xlu0 %v849_v54, %s1761_s8  ;;  %v738_v54 = vstv %s1576_s12  ;;  %s1589_s12 = sld [smem:[#allocation6 + $0x49]] }
  0xd7   : > { %v739_v61 = vmul.f32 %v738_v54, %v1916_v63 }
  0xdc   : > { %v868_v48 = vstv %s1589_s12  ;;  %s2176_s12 = sld [smem:[#allocation6 + $0x4c]] }
  0xdd   : > { %1113 = vrot.lane.b32.xlu2 %v1111_v59, %s1760_s6  ;;  %791 = vrot.lane.b32.xlu1 %v789_v60, %s1763_s14  ;;  %v292_v59 = vstv %s1538_s17  ;;  %v1241_v60 = vstv %s1626_s19  ;;  %s1628_s17 = sld [smem:[#allocation6 + $0x14]] }
  0xde   : > { %421 = vrot.lane.b32.xlu0 %v419_v58, %s1761_s8  ;;  %v291_v58 = vld [vmem:[#allocation3 + $0x1] sm:$0xff]  ;;  %s1617_s19 = sld [smem:[#allocation6 + $0x4b]] }
  0xe5   : > { %992 = vrot.lane.b32.xlu2 %v990_v2, %s1761_s8  ;;  %831 = vrot.lane.b32.xlu1 %v829_v3, %s1760_s6  ;;  %v1242_v2 = vmul.f32 %v1241_v60, %v1916_v63  ;;  %v296_v3 = vld [vmem:[#allocation3 + $0x2] sm:$0xff]  ;;  %v1261_v60 = vstv %s1628_s17  ;;  %s2197_s17 = sld [smem:[#allocation6 + $0x52]] }
  0xe6   : > { %540 = vrot.lane.b32.xlu0 %v538_v1, %s1760_s6  ;;  %v293_v1 = vmul.f32 %v292_v59, %v291_v58  ;;  %v1130_v59 = vstv %s1615_s16  ;;  %s2186_s16 = sld [smem:[#allocation6 + $0x2e]] }
  0xe8   : > { %v294_v6 = vadd.f32 %v293_v1, %v289_v0  ;;  %v1131_v0 = vmul.f32 %v1130_v59, %v1884_v52  ;;  %v1262_v1 = vmul.f32 %v1261_v60, %v1916_v63 }
  0xed   : > { %972 = vrot.lane.b32.xlu1 %v970_v10, %s1760_s6  ;;  %400 = vrot.lane.b32.xlu2 %v398_v7, %s1760_s6  ;;  %v298_v7 = vmul.f32 %v297_v4, %v296_v3  ;;  %v1120_v10 = vstv %s1614_s24  ;;  %s2098_s24 = sld [smem:[#allocation6 + $0x31]] }
  0xee   : > { %600 = vrot.lane.b32.xlu0 %v598_v9, %s1765_s20  ;;  %v718_v9 = vstv %s1574_s23  ;;  %v1121_v15 = vmul.f32 %v1120_v10, %v1916_v63  ;;  %s1605_s23 = sld [smem:[#allocation6 + $0x51]] }
  0xef   : > { %v719_v12 = vmul.f32 %v718_v9, %v1916_v63  ;;  %v299_v13 = vadd.f32 %v298_v7, %v294_v6  ;;  %v1140_v9 = vstv %s1616_s22  ;;  %s2226_s22 = sld [smem:[#allocation6 + $0x53]] }
  0xf1   : > { %v1540_v18 = vmul.f32 -1.442695, %v299_v13  ;;  %v384_v13 = vld [vmem:[#allocation2] sm:$0x3] }
  0xf3   : > { %1697 = vpow2.f32 %v1540_v18  ;;  %v1141_v18 = vmul.f32 %v1140_v9, %v1916_v63  ;;  %v391_v23 = vstv %s2098_s24  ;;  %s2259_s24 = sld [smem:[#allocation6 + $0x5e]] }
  0xf4   : > { %v1029_v10 = vstv %s1605_s23  ;;  %s2236_s23 = sld [smem:[#allocation6 + $0x60]] }
  0xf5   : > { %505 = vrot.lane.b32.xlu1 %v503_v19, %s1763_s14  ;;  %442 = vrot.lane.b32.xlu2 %v440_v20, %s1764_s15  ;;  %v979_v20 = vstv %s1600_s25  ;;  %s2107_s25 = sld [smem:[#allocation6 + $0x50]] }
  0xf6   : > { %701 = vrot.lane.b32.xlu0 %v699_v21, %s1761_s8  ;;  %v959_v21 = vstv %s1598_s26  ;;  %v980_v24 = vmul.f32 %v979_v20, %v1916_v63  ;;  %s2111_s26 = sld [smem:[#allocation6 + $0x57]]  ;;  %v1030_v20 = vmul.f32 %v1029_v10, %v1884_v52  ;;  %v1301_v10 = vstv %s1632_s28 }
  0xf7   : > { %v960_v25 = vmul.f32 %v959_v21, %v1916_v63  ;;  %v385_v21 = vld [vmem:[#allocation2 + $0x3] sm:$0x3]  ;;  %s2341_s28 = sld [smem:[#allocation6 + $0x61]] }
  0xfd   : > { %580 = vrot.lane.b32.xlu1 %v578_v35, %s1764_s15  ;;  %463 = vrot.lane.b32.xlu2 %v461_v36, %s1765_s20  ;;  %v1100_v35 = vstv %s1612_s29  ;;  %v1698_v36 = vpop.eup %1697  ;;  %s2154_s29 = sld [smem:[#allocation6 + $0x21]] }
  0xfe   : > { %781 = vrot.lane.b32.xlu0 %v779_v38, %s1763_s14  ;;  %v859_v38 = vmul.f32 %v858_v32, %v1916_v63  ;;  %v1101_v39 = vmul.f32 %v1100_v35, %v1916_v63 }
 0x105   : > { %640 = vrot.lane.b32.xlu1 %v638_v42, %s1763_s14  ;;  %484 = vrot.lane.b32.xlu2 %v482_v43, %s1762_s11  ;;  %v2065_v42 = vadd.f32 1.0, %v1698_v36  ;;  %v392_v36 = vmul.f32 %v391_v23, %v385_v21 }
 0x106   : > { %821 = vrot.lane.b32.xlu0 %v819_v44, %s1760_s6 }
 0x107   : > { %v2020_v45 = vpop.permute.xlu2 %411  ;;  %1699 = vrcp.f32 %v2065_v42  ;;  %vm309_vm11 = vweird.f32 %v2065_v42  ;;  %v313_v32 = vand.u32 2147483647, %v2065_v42 }
 0x109   : > { %vm314_vm15 = vcmp.eq.f32.partialorder %v313_v32, 8.507059e+37 }
 0x10d   : > { %681 = vrot.lane.b32.xlu1 %v679_v49, %s1760_s6  ;;  %560 = vrot.lane.b32.xlu2 %v558_v50, %s1761_s8  ;;  %v1271_v49 = vstv %s1629_s13  ;;  %v1252_v50 = vmul.f32 %v1251_v47, %v1884_v52  ;;  %v2082_v55 = vpop.eup %1699  ;;  %s2180_s13 = sld [smem:[#allocation6 + $0x27]] }
 0x10e   : > { %841 = vrot.lane.b32.xlu0 %v839_v51, %s1761_s8  ;;  %v869_v51 = vmul.f32 %v868_v48, %v1884_v52  ;;  %v1272_v54 = vmul.f32 %v1271_v49, %v1884_v52  ;;  %vm310_vm12 = vweird.f32 %v2082_v55  ;;  %v908_v48 = vstv %s2111_s26  ;;  %s2280_s26 = sld [smem:[#allocation6 + $0x29]] }
 0x10f   : > { %v2028_v53 = vpop.permute.xlu2 %516  ;;  %vm2127_vm13 = vmor %vm309_vm11, %vm310_vm12 }
 0x115   : > { %741 = vrot.lane.b32.xlu1 %v739_v61, %s1765_s20  ;;  %620 = vrot.lane.b32.xlu2 %v618_v62, %s1762_s11  ;;  %v1150_v61 = vstv %s1617_s19  ;;  %v305_v62 = vmul.f32 %v2082_v55, %v2065_v42  ;;  %s2201_s19 = sld [smem:[#allocation6 + $0x2d]] }
 0x116   : > { %1244 = vrot.lane.b32.xlu0 %v1242_v2, %s1760_s6  ;;  %v1151_v2 = vmul.f32 %v1150_v61, %v1884_v52  ;;  %v909_v61 = vmul.f32 %v908_v48, %v1884_v52  ;;  %v1180_v48 = vstv %s2161_s9  ;;  %s1772_s9 = smov 123  }
 0x117   : > { %v2036_v5 = vpop.permute.xlu2 %590  ;;  %v306_v3 = vsub.f32 1.0, %v305_v62 }
 0x11d   : > { %761 = vrot.lane.b32.xlu1 %v759_v11, %s1762_s11  ;;  %721 = vrot.lane.b32.xlu2 %v719_v12, %s1764_s15  ;;  %v307_v11 = vmul.f32 %v2082_v55, %v306_v3 }
 0x11e   : > { %1123 = vrot.lane.b32.xlu0 %v1121_v15, %s1761_s8  ;;  %v1010_v15 = vmul.f32 %v1009_v8, %v1884_v52  ;;  %v1019_v8 = vstv %s2140_s27  ;;  %s1768_s27 = smov 127  }
 0x11f   : > { %v2044_v16 = vpop.permute.xlu2 %650  ;;  %v2046_v17 = vpop.permute.xlu1 %432 }
 0x120   : > { %v2048_v19 = vpop.permute.xlu0 %495 }
 0x125   : > { %982 = vrot.lane.b32.xlu1 %v980_v24, %s1761_s8  ;;  %962 = vrot.lane.b32.xlu2 %v960_v25, %s1760_s6  ;;  %v315_v24 = vand.u32 2147483648, %v2065_v42 }
 0x126   : > { %1002 = vrot.lane.b32.xlu0 %v1000_v27, %s1764_s15  ;;  %v308_v27 = vadd.f32 %v2082_v55, %v307_v11 }
 0x127   : > { %v2056_v28 = vpop.permute.xlu2 %691  ;;  %v2058_v29 = vpop.permute.xlu1 %453  ;;  %v316_v42 = vor.u32 1.1754944e-38, %v315_v24 }
 0x128   : > { %v2060_v31 = vpop.permute.xlu0 %570  ;;  %v455_v23 = vrot.slane %v2058_v29, 1 }
 0x12d   : > { %861 = vrot.lane.b32.xlu1 %v859_v38, %s1764_s15  ;;  %1103 = vrot.lane.b32.xlu2 %v1101_v39, %s1760_s6  ;;  %v888_v39 = vstv %s2107_s25  ;;  %s2275_s25 = sld [smem:[#allocation6 + $0x2f]] }
 0x12e   : > { %881 = vrot.lane.b32.xlu0 %v879_v40, %s1765_s20  ;;  %v413_v40 = vrot.slane %v2020_v45, 1  ;;  %v889_v59 = vmul.f32 %v888_v39, %v1884_v52  ;;  %v898_v39 = vstv %s2158_s30 }
 0x12f   : > { %v2070_v43 = vpop.permute.xlu2 %771  ;;  %v2072_v44 = vpop.permute.xlu1 %474 }
 0x130   : > { %v2074_v46 = vpop.permute.xlu0 %630  ;;  %v414_v60 = vsel %vm403_vm14, %v2020_v45, %v413_v40  ;;  %v434_v45 = vrot.slane %v2046_v17, 1  ;;  %v456_v40 = vsel %vm445_vm1, %v2058_v29, %v455_v23 }
 0x132   : > { %v435_v21 = vsel %vm424_vm0, %v2046_v17, %v434_v45  ;;  %v1059_v45 = vstv %s2186_s16 }
 0x135   : > { %1254 = vrot.lane.b32.xlu1 %v1252_v50, %s1760_s6  ;;  %871 = vrot.lane.b32.xlu2 %v869_v51, %s1764_s15  ;;  %s2093_s6 = sld [smem:[#allocation6]]  ;;  %v312_v50 = vsel %vm2127_vm13, %v2082_v55, %v308_v27 }
 0x136   : > { %1274 = vrot.lane.b32.xlu0 %v1272_v54, %s1761_s8  ;;  %v317_v62 = vsel %vm314_vm15, %v316_v42, %v312_v50  ;;  %vm801_vm15 = vcmask 1031168  }
 0x137   : > { %v2085_v56 = vpop.permute.xlu2 %1113  ;;  %v2087_v57 = vpop.permute.xlu1 %550 }
 0x138   : > { %v2089_v58 = vpop.permute.xlu0 %731 }
 0x13b   : > { %v387_v12 = vstv %s2093_s6  ;;  %s2252_s6 = sld [smem:[#allocation6 + $0x59]] }
 0x13c   : > { %v388_v25 = vmul.f32 %v387_v12, %v384_v13 }
 0x13d   : > { %1133 = vrot.lane.b32.xlu1 %v1131_v0, %s1761_s8  ;;  %1264 = vrot.lane.b32.xlu2 %v1262_v1, %s1761_s8  ;;  %s2134_s8 = sld [smem:[#allocation6 + $0x1b]] }
 0x13e   : > { %1153 = vrot.lane.b32.xlu0 %v1151_v2, %s1764_s15  ;;  %v393_v49 = vadd.f32 %v392_v36, %v388_v25 }
 0x13f   : > { %v2103_v4 = vpop.permute.xlu2 %992  ;;  %v2105_v6 = vpop.permute.xlu1 %610 }
 0x140   : > { %v2109_v7 = vpop.permute.xlu0 %751 }
 0x143   : > { %v1281_v3 = vstv %s2134_s8  ;;  %s2308_s8 = sld [smem:[#allocation6 + $0x30]] }
 0x144   : > { %v1282_v13 = vmul.f32 %v1281_v3, %v1916_v63  ;;  %v1039_v3 = vstv %s2180_s13 }
 0x145   : > { %1012 = vrot.lane.b32.xlu1 %v1010_v15, %s1764_s15  ;;  %1143 = vrot.lane.b32.xlu2 %v1141_v18, %s1764_s15  ;;  %v1020_v15 = vmul.f32 %v1019_v8, %v1916_v63  ;;  %v1291_v8 = vstv %s2176_s12  ;;  %s1773_s12 = smov 122  }
 0x146   : > { %1032 = vrot.lane.b32.xlu0 %v1030_v20, %s1765_s20  ;;  %v1302_v20 = vmul.f32 %v1301_v10, %v1916_v63 }
 0x147   : > { %v401_v37 = vpop.permute.xlu2 %400  ;;  %v2131_v38 = vpop.permute.xlu1 %711 }
 0x148   : > { %v402_v41 = vrot.slane %v401_v37, 1  ;;  %v2137_v47 = vpop.permute.xlu0 %851 }
 0x14a   : > { %v404_v51 = vsel %vm403_vm14, %v401_v37, %v402_v41  ;;  %v1160_v37 = vstv %s2154_s29  ;;  %v476_v41 = vrot.slane %v2072_v44, 1 }
 0x14b   : > { %v406_v54 = vadd.f32 %v404_v51, %v393_v49  ;;  %v1161_v50 = vmul.f32 %v1160_v37, %v1916_v63  ;;  %v899_v51 = vmul.f32 %v898_v39, %v1916_v63 }
 0x14c   : > { %v477_v29 = vsel %vm466_vm2, %v2072_v44, %v476_v41  ;;  %v1069_v41 = vstv %s2209_s21 }
 0x14d   : > { %891 = vrot.lane.b32.xlu1 %v889_v59, %s1765_s20  ;;  %1390 = vperm.xlu2 %1691, %v317_v62   ;;  %v416_v0 = vadd.f32 %v414_v60, %v406_v54  ;;  %v1181_v59 = vmul.f32 %v1180_v48, %v1916_v63 }
 0x14e   : > { %911 = vrot.lane.b32.xlu0 %v909_v61, %s1762_s11 }
 0x14f   : > { %v443_v55 = vpop.permute.xlu2 %442  ;;  %v2152_v1 = vpop.permute.xlu1 %791 }
 0x150   : > { %v422_v2 = vpop.permute.xlu0 %421  ;;  %v444_v11 = vrot.slane %v443_v55, 1 }
 0x151   : > { %v423_v9 = vrot.slane %v422_v2, 1 }
 0x152   : > { %v446_v25 = vsel %vm445_vm1, %v443_v55, %v444_v11  ;;  %v497_v55 = vrot.slane %v2048_v19, 1 }
 0x153   : > { %v425_v12 = vsel %vm424_vm0, %v422_v2, %v423_v9 }
 0x154   : > { %v427_v18 = vadd.f32 %v425_v12, %v416_v0  ;;  %v1040_v12 = vmul.f32 %v1039_v3, %v1916_v63 }
 0x155   : > { %1284 = vrot.lane.b32.xlu1 %v1282_v13, %s1764_s15  ;;  %1022 = vrot.lane.b32.xlu2 %v1020_v15, %s1765_s20  ;;  %v1292_v13 = vmul.f32 %v1291_v8, %v1884_v52  ;;  %v498_v15 = vsel %vm487_vm3, %v2048_v19, %v497_v55  ;;  %v1170_v19 = vstv %s2197_s17  ;;  %v1210_v8 = vstv %s2236_s23 }
 0x156   : > { %v437_v24 = vadd.f32 %v435_v21, %v427_v18  ;;  %1304 = vrot.lane.b32.xlu0 %v1302_v20, %s1765_s20  ;;  %v552_v18 = vrot.slane %v2087_v57, 1  ;;  %v1060_v20 = vmul.f32 %v1059_v45, %v1916_v63 }
 0x157   : > { %v464_v27 = vpop.permute.xlu2 %463  ;;  %v2174_v32 = vpop.permute.xlu1 %831 }
 0x158   : > { %v448_v35 = vadd.f32 %v446_v25, %v437_v24  ;;  %v465_v17 = vrot.slane %v464_v27, 1  ;;  %v541_v36 = vpop.permute.xlu0 %540  ;;  %v518_v24 = vrot.slane %v2028_v53, 1 }
 0x159   : > { %v542_v60 = vrot.slane %v541_v36, 1 }
 0x15a   : > { %v458_v42 = vadd.f32 %v456_v40, %v448_v35  ;;  %v467_v49 = vsel %vm466_vm2, %v464_v27, %v465_v17  ;;  %v918_v35 = vstv %s2201_s19  ;;  %v572_v17 = vrot.slane %v2060_v31, 1 }
 0x15b   : > { %v543_v9 = vsel %vm403_vm14, %v541_v36, %v542_v60 }
 0x15c   : > { %v469_v54 = vadd.f32 %v467_v49, %v458_v42  ;;  %v545_v21 = vadd.f32 %v543_v9, %v1935_v14  ;;  %v553_v14 = vsel %vm403_vm14, %v2087_v57, %v552_v18  ;;  %v1171_v57 = vmul.f32 %v1170_v19, %v1884_v52 }
 0x15d   : > { %1163 = vrot.lane.b32.xlu1 %v1161_v50, %s1765_s20  ;;  %901 = vrot.lane.b32.xlu2 %v899_v51, %s1762_s11  ;;  %v919_v51 = vmul.f32 %v918_v35, %v1916_v63  ;;  %v1211_v18 = vmul.f32 %v1210_v8, %v1884_v52 }
 0x15e   : > { %1183 = vrot.lane.b32.xlu0 %v1181_v59, %s1762_s11  ;;  %v479_v61 = vadd.f32 %v477_v29, %v469_v54  ;;  %v555_v40 = vadd.f32 %v553_v14, %v545_v21  ;;  %v519_v54 = vsel %vm508_vm4, %v2028_v53, %v518_v24  ;;  %v573_v59 = vsel %vm424_vm0, %v2060_v31, %v572_v17 }
 0x15f   : > { %v485_v62 = vpop.permute.xlu2 %484  ;;  %v2199_v0 = vpop.permute.xlu1 %972  ;;  %v1070_v29 = vmul.f32 %v1069_v41, %v1884_v52  ;;  %v592_v53 = vrot.slane %v2036_v5, 1  ;;  %v928_v17 = vstv %s2259_s24  ;;  %v2288_v41 = vld [vmem:[#allocation2 + $0x3] sm:$0x7] }
 0x160   : > { %v486_v2 = vrot.slane %v485_v62, 1  ;;  %v2204_v44 = vpop.permute.xlu0 %600 }
 0x161   : > { %v602_v45 = vrot.slane %v2204_v44, 1 }
 0x162   : > { %v488_v10 = vsel %vm487_vm3, %v485_v62, %v486_v2  ;;  %v1311_v2 = vstv %s2226_s22 }
 0x163   : > { %v490_v11 = vadd.f32 %v488_v10, %v479_v61  ;;  %v603_v21 = vsel %vm466_vm2, %v2204_v44, %v602_v45  ;;  %v833_v44 = vrot.slane %v2174_v32, 1 }
 0x165   : > { %1042 = vrot.lane.b32.xlu1 %v1040_v12, %s1762_s11  ;;  %1294 = vrot.lane.b32.xlu2 %v1292_v13, %s1764_s15  ;;  %v500_v23 = vadd.f32 %v498_v15, %v490_v11  ;;  %s2233_s15 = sld [smem:[#allocation6 + $0x58]]  ;;  %v1312_v11 = vmul.f32 %v1311_v2, %v1884_v52  ;;  %v593_v13 = vsel %vm445_vm1, %v2036_v5, %v592_v53  ;;  %v612_v15 = vrot.slane %v2105_v6, 1 }
 0x166   : > { %1062 = vrot.lane.b32.xlu0 %v1060_v20, %s1763_s14  ;;  %v974_v2 = vrot.slane %v2199_v0, 1 }
 0x167   : > { %v561_v25 = vpop.permute.xlu2 %560  ;;  %v506_v27 = vpop.permute.xlu1 %505  ;;  %v613_v35 = vsel %vm466_vm2, %v2105_v6, %v612_v15  ;;  %v929_v6 = vmul.f32 %v2288_v41, %v928_v17  ;;  %v1706_v15 = vld [vmem:[#allocation2] sm:$0x7] }
 0x168   : > { %v562_v36 = vrot.slane %v561_v25, 1  ;;  %v507_v37 = vrot.slane %v506_v27, 1  ;;  %v2231_v39 = vpop.permute.xlu0 %701 }
 0x16a   : > { %v563_v48 = vsel %vm424_vm0, %v561_v25, %v562_v36  ;;  %v509_v42 = vsel %vm508_vm4, %v506_v27, %v507_v37  ;;  %v1190_v27 = vstv %s2252_s6 }
 0x16b   : > { %v565_v49 = vadd.f32 %v563_v48, %v555_v40  ;;  %v511_v50 = vadd.f32 %v509_v42, %v500_v23  ;;  %v1049_v3 = vstv %s2233_s15  ;;  %v1191_v48 = vmul.f32 %v2288_v41, %v1190_v27 }
 0x16c   : > { %v1050_v12 = vmul.f32 %v1049_v3, %v1884_v52  ;;  %v632_v52 = vrot.slane %v2074_v46, 1  ;;  %v652_v42 = vrot.slane %v2044_v16, 1  ;;  %v713_v27 = vrot.slane %v2131_v38, 1 }
 0x16d   : > { %v2247_v60 = vadd.f32 %v519_v54, %v511_v50  ;;  %921 = vrot.lane.b32.xlu1 %v919_v51, %s1763_s14  ;;  %1173 = vrot.lane.b32.xlu2 %v1171_v57, %s1765_s20  ;;  %v575_v63 = vadd.f32 %v573_v59, %v565_v49  ;;  %v834_v54 = vsel %vm403_vm14, %v2174_v32, %v833_v44  ;;  %v693_v32 = vrot.slane %v2056_v28, 1 }
 0x16e   : > { %1072 = vrot.lane.b32.xlu0 %v1070_v29, %s1763_s14  ;;  %v633_v51 = vsel %vm487_vm3, %v2074_v46, %v632_v52  ;;  %v975_v52 = vsel %vm403_vm14, %v2199_v0, %v974_v2 }
 0x16f   : > { %v621_v61 = vpop.permute.xlu2 %620  ;;  %v581_v62 = vpop.permute.xlu1 %580 }
 0x170   : > { %v582_v55 = vrot.slane %v581_v62, 1  ;;  %v2255_v31 = vpop.permute.xlu0 %781  ;;  %v622_v23 = vrot.slane %v621_v61, 1 }
 0x172   : > { %v583_v9 = vsel %vm445_vm1, %v581_v62, %v582_v55  ;;  %v623_v37 = vsel %vm487_vm3, %v621_v61, %v622_v23  ;;  %v653_v61 = vsel %vm508_vm4, %v2044_v16, %v652_v42  ;;  %v1321_v55 = vstv %s2280_s26 }
 0x173   : > { %v585_v10 = vadd.f32 %v583_v9, %v575_v63  ;;  %v853_v9 = vrot.slane %v2137_v47, 1  ;;  %v703_v16 = vrot.slane %v2231_v39, 1  ;;  %v714_v42 = vsel %vm424_vm0, %v2131_v38, %v713_v27 }
 0x175   : > { %v595_v20 = vadd.f32 %v593_v13, %v585_v10  ;;  %1314 = vrot.lane.b32.xlu1 %v1312_v11, %s1765_s20  ;;  %1052 = vrot.lane.b32.xlu2 %v1050_v12, %s1762_s11  ;;  %s2302_s20 = sld [smem:[#allocation6 + $0x5a]] }
 0x176   : > { %1213 = vrot.lane.b32.xlu0 %v1211_v18, %s1763_s14 }
 0x177   : > { %v605_v24 = vadd.f32 %v603_v21, %v595_v20  ;;  %v2277_v5 = vpop.permute.xlu2 %721  ;;  %v641_v25 = vpop.permute.xlu1 %640 }
 0x178   : > { %v822_v19 = vpop.permute.xlu0 %821  ;;  %v642_v40 = vrot.slane %v641_v25, 1  ;;  %v723_v17 = vrot.slane %v2277_v5, 1 }
 0x179   : > { %v615_v14 = vadd.f32 %v613_v35, %v605_v24  ;;  %v823_v36 = vrot.slane %v822_v19, 1  ;;  %v1322_v24 = vmul.f32 %v1706_v15, %v1321_v55 }
 0x17a   : > { %v643_v29 = vsel %vm508_vm4, %v641_v25, %v642_v40  ;;  %v694_v25 = vsel %vm403_vm14, %v2056_v28, %v693_v32  ;;  %v704_v28 = vsel %vm424_vm0, %v2231_v39, %v703_v16 }
 0x17b   : > { %v625_v49 = vadd.f32 %v623_v37, %v615_v14  ;;  %v824_v50 = vsel %vm403_vm14, %v822_v19, %v823_v36  ;;  %v1341_v37 = vstv %s2308_s8  ;;  %v1331_v40 = vstv %s2302_s20 }
 0x17c   : > { %v826_v57 = vadd.f32 %v824_v50, %v1944_v22  ;;  %v1200_v22 = vstv %s2275_s25  ;;  %v1342_v38 = vmul.f32 %v1706_v15, %v1341_v37 }
 0x17d   : > { %v635_v59 = vadd.f32 %v633_v51, %v625_v49  ;;  %1193 = vrot.lane.b32.xlu1 %v1191_v48, %s1762_s11  ;;  %931 = vrot.lane.b32.xlu2 %v929_v6, %s1763_s14  ;;  %v1201_v18 = vmul.f32 %v1706_v15, %v1200_v22  ;;  %v733_v48 = vrot.slane %v2089_v58, 1  ;;  %v724_v51 = vsel %vm445_vm1, %v2277_v5, %v723_v17 }
 0x17e   : > { %v836_v63 = vadd.f32 %v834_v54, %v826_v57  ;;  %v753_v5 = vrot.slane %v2109_v7, 1 }
 0x17f   : > { %v645_v62 = vadd.f32 %v643_v29, %v635_v59  ;;  %v963_v46 = vpop.permute.xlu2 %962  ;;  %v682_v53 = vpop.permute.xlu1 %681  ;;  %v1332_v59 = vmul.f32 %v2288_v41, %v1331_v40 }
 0x180   : > { %v964_v3 = vrot.slane %v963_v46, 1  ;;  %v683_v8 = vrot.slane %v682_v53, 1  ;;  %v842_v45 = vpop.permute.xlu0 %841 }
 0x181   : > { %v843_v10 = vrot.slane %v842_v45, 1  ;;  %v655_v11 = vadd.f32 %v653_v61, %v645_v62 }
 0x182   : > { %v965_v12 = vsel %vm403_vm14, %v963_v46, %v964_v3  ;;  %v684_v13 = vsel %vm403_vm14, %v682_v53, %v683_v8  ;;  %v734_v46 = vsel %vm445_vm1, %v2089_v58, %v733_v48  ;;  %v773_v3 = vrot.slane %v2070_v43, 1 }
 0x183   : > { %v967_v20 = vadd.f32 %v965_v12, %v1949_v26  ;;  %v686_v21 = vadd.f32 %v684_v13, %v1954_v30  ;;  %v844_v23 = vsel %vm424_vm0, %v842_v45, %v843_v10  ;;  %657 = vrot.lane.b32.xlu0 %v655_v11, %s1768_s27  ;;  %v854_v26 = vsel %vm424_vm0, %v2137_v47, %v853_v9 }
 0x184   : > { %v846_v35 = vadd.f32 %v844_v23, %v836_v63  ;;  %v1115_v47 = vrot.slane %v2085_v56, 1  ;;  %v754_v58 = vsel %vm466_vm2, %v2109_v7, %v753_v5  ;;  %v783_v11 = vrot.slane %v2255_v31, 1 }
 0x185   : > { %v696_v30 = vadd.f32 %v694_v25, %v686_v21  ;;  %1203 = vrot.lane.b32.xlu1 %v1201_v18, %s1763_s14  ;;  %1324 = vrot.lane.b32.xlu2 %v1322_v24, %s1762_s11  ;;  %v2328_v19 = vadd.f32 %v975_v52, %v967_v20  ;;  %v774_v18 = vsel %vm487_vm3, %v2070_v43, %v773_v3  ;;  %v793_v20 = vrot.slane %v2152_v1, 1 }
 0x186   : > { %v2333_v44 = vadd.f32 %v854_v26, %v846_v35  ;;  %v1116_v62 = vsel %vm403_vm14, %v2085_v56, %v1115_v47  ;;  %v784_v23 = vsel %vm508_vm4, %v2255_v31, %v783_v11  ;;  %v994_v52 = vrot.slane %v2103_v4, 1 }
 0x187   : > { %v706_v14 = vadd.f32 %v704_v28, %v696_v30  ;;  %v1104_v0 = vpop.permute.xlu2 %1103  ;;  %v742_v36 = vpop.permute.xlu1 %741 }
 0x188   : > { %v1105_v49 = vrot.slane %v1104_v0, 1  ;;  %v1245_v50 = vpop.permute.xlu0 %1244  ;;  %v743_v54 = vrot.slane %v742_v36, 1  ;;  %v995_v17 = vsel %vm424_vm0, %v2103_v4, %v994_v52 }
 0x189   : > { %v716_v39 = vadd.f32 %v714_v42, %v706_v14  ;;  %v1246_v6 = vrot.slane %v1245_v50, 1 }
 0x18a   : > { %v1106_v57 = vsel %vm403_vm14, %v1104_v0, %v1105_v49  ;;  %v744_v55 = vsel %vm466_vm2, %v742_v36, %v743_v54 }
 0x18b   : > { %v1108_v29 = vadd.f32 %v1106_v57, %v1958_v33  ;;  %v726_v63 = vadd.f32 %v724_v51, %v716_v39  ;;  %v1247_v61 = vsel %vm403_vm14, %v1245_v50, %v1246_v6  ;;  %v2385_v39 = vld [vmem:[%s1826_s7] sm:$0xff]  ;;  %v2389_v51 = vld [vmem:[%s1826_s7 + $0x8] sm:$0xff]  ;;  %s1770_s7 = smov 124  }
 0x18c   : > { %v2355_v53 = vadd.f32 %v1247_v61, %v1960_v34  ;;  %v1351_v34 = vstv %s2341_s28 }
 0x18d   : > { %v736_v22 = vadd.f32 %v734_v46, %v726_v63  ;;  %1344 = vrot.lane.b32.xlu1 %v1342_v38, %s1763_s14  ;;  %1334 = vrot.lane.b32.xlu2 %v1332_v59, %s1762_s11  ;;  %v1118_v33 = vadd.f32 %v1116_v62, %v1108_v29  ;;  %v1352_v15 = vmul.f32 %v2288_v41, %v1351_v34  ;;  %s1769_s11 = smov 126  }
 0x18e   : > { %v794_v41 = vsel %vm508_vm4, %v2152_v1, %v793_v20 }
 0x18f   : > { %v746_v32 = vadd.f32 %v744_v55, %v736_v22  ;;  %v872_v2 = vpop.permute.xlu2 %871  ;;  %v762_v56 = vpop.permute.xlu1 %761 }
 0x190   : > { %v763_v8 = vrot.slane %v762_v56, 1  ;;  %v1124_v45 = vpop.permute.xlu0 %1123  ;;  %v873_v36 = vrot.slane %v872_v2, 1 }
 0x191   : > { %v756_v9 = vadd.f32 %v754_v58, %v746_v32  ;;  %v1125_v10 = vrot.slane %v1124_v45, 1 }
 0x192   : > { %v764_v16 = vsel %vm487_vm3, %v762_v56, %v763_v8  ;;  %v874_v48 = vsel %vm445_vm1, %v872_v2, %v873_v36 }
 0x193   : > { %v766_v12 = vadd.f32 %v764_v16, %v756_v9  ;;  %v1126_v13 = vsel %vm424_vm0, %v1124_v45, %v1125_v10 }
 0x194   : > { %v1128_v7 = vadd.f32 %v1126_v13, %v1118_v33 }
 0x195   : > { %v776_v21 = vadd.f32 %v774_v18, %v766_v12  ;;  %1354 = vrot.lane.b32.xlu2 %v1352_v15, %s1763_s14  ;;  %s1771_s14 = smov 125  }
 0x197   : > { %v1265_v24 = vpop.permute.xlu2 %1264  ;;  %v983_v25 = vpop.permute.xlu1 %982  ;;  %v786_v27 = vadd.f32 %v784_v23, %v776_v21 }
 0x198   : > { %v984_v35 = vrot.slane %v983_v25, 1  ;;  %v1003_v26 = vpop.permute.xlu0 %1002  ;;  %v1266_v4 = vrot.slane %v1265_v24, 1 }
 0x199   : > { %v796_v43 = vadd.f32 %v794_v41, %v786_v27  ;;  %v1004_v20 = vrot.slane %v1003_v26, 1 }
 0x19a   : > { %v985_v30 = vsel %vm424_vm0, %v983_v25, %v984_v35  ;;  %v1267_v38 = vsel %vm424_vm0, %v1265_v24, %v1266_v4 }
 0x19b   : > { %v987_v28 = vadd.f32 %v985_v30, %v2328_v19 }
 0x19d   : > { %v997_v14 = vadd.f32 %v995_v17, %v987_v28  ;;  %798 = vrot.lane.b32.xlu2 %v796_v43, %s1769_s11 }
 0x19f   : > { %v1144_v31 = vpop.permute.xlu2 %1143  ;;  %v862_v0 = vpop.permute.xlu1 %861 }
 0x1a0   : > { %v863_v37 = vrot.slane %v862_v0, 1  ;;  %v882_v1 = vpop.permute.xlu0 %881  ;;  %v1145_v2 = vrot.slane %v1144_v31, 1 }
 0x1a1   : > { %v883_v35 = vrot.slane %v882_v1, 1 }
 0x1a2   : > { %v864_v40 = vsel %vm445_vm1, %v862_v0, %v863_v37  ;;  %v1146_v8 = vsel %vm445_vm1, %v1144_v31, %v1145_v2 }
 0x1a3   : > { %v866_v47 = vadd.f32 %v864_v40, %v2333_v44  ;;  %v884_v0 = vsel %vm466_vm2, %v882_v1, %v883_v35 }
 0x1a5   : > { %v876_v19 = vadd.f32 %v874_v48, %v866_v47 }
 0x1a7   : > { %v1255_v42 = vpop.permute.xlu1 %1254  ;;  %v1391_v49 = vpop.permute.xlu2 %1390 }
 0x1a8   : > { %v1256_v50 = vrot.slane %v1255_v42, 1  ;;  %v1393_v6 = vmul.f32 %v2385_v39, %v1391_v49  ;;  %v1394_v57 = vmul.f32 %v2389_v51, %v1391_v49  ;;  %v1275_v54 = vpop.permute.xlu0 %1274 }
 0x1a9   : > { %v1276_v44 = vrot.slane %v1275_v54, 1 }
 0x1aa   : > { %v1257_v59 = vsel %vm403_vm14, %v1255_v42, %v1256_v50  ;;  %v1396_v29 = vpack.c.bf16 %v1393_v6, %v1393_v6  ;;  %v1397_v63 = vpack.c.bf16 %v1394_v57, %v1394_v57 }
 0x1ab   : > { %v1259_v61 = vadd.f32 %v1257_v59, %v2355_v53  ;;  %v1277_v22 = vsel %vm424_vm0, %v1275_v54, %v1276_v44 }
 0x1ac   : > { %v1404_v62 = vsel %vm1402_vm5, %v1396_v29, 0  ;;  %v1407_v46 = vsel %vm1402_vm5, %v1397_v63, 0 }
 0x1ad   : > { %v1269_v5 = vadd.f32 %v1267_v38, %v1259_v61  ;;  %1416 = vmatpush.bf16.msra.mxu0 %v1404_v62  ;;  %1429 = vmatpush.bf16.msra.mxu1 %v1407_v46 }
 0x1af   : > { %v2396_v33 = vadd.f32 %v1277_v22, %v1269_v5  ;;  %v1134_v55 = vpop.permute.xlu1 %1133  ;;  %v1023_v32 = vpop.permute.xlu2 %1022 }
 0x1b0   : > { %v1135_v56 = vrot.slane %v1134_v55, 1  ;;  %v2398_v3 = vpop.permute.xlu0 %1153  ;;  %v1024_v27 = vrot.slane %v1023_v32, 1 }
 0x1b2   : > { %v1136_v58 = vsel %vm424_vm0, %v1134_v55, %v1135_v56  ;;  %v1025_v28 = vsel %vm466_vm2, %v1023_v32, %v1024_v27 }
 0x1b3   : > { %v1138_v53 = vadd.f32 %v1136_v58, %v1128_v7  ;;  %v1005_v7 = vsel %vm445_vm1, %v1003_v26, %v1004_v20  ;;  %v886_v26 = vadd.f32 %v884_v0, %v876_v19 }
 0x1b4   : > { %v1007_v24 = vadd.f32 %v1005_v7, %v997_v14 }
 0x1b5   : > { %v2402_v45 = vadd.f32 %v1146_v8, %v1138_v53 }
 0x1b7   : > { %v1013_v34 = vpop.permute.xlu1 %1012  ;;  %v902_v9 = vpop.permute.xlu2 %901 }
 0x1b8   : > { %v1033_v10 = vpop.permute.xlu0 %1032  ;;  %v1014_v21 = vrot.slane %v1013_v34, 1  ;;  %v903_v40 = vrot.slane %v902_v9, 1 }
 0x1b9   : > { %v1034_v17 = vrot.slane %v1033_v10, 1 }
 0x1ba   : > { %v1015_v23 = vsel %vm445_vm1, %v1013_v34, %v1014_v21  ;;  %v904_v57 = vsel %vm487_vm3, %v902_v9, %v903_v40 }
 0x1bb   : > { %v1017_v41 = vadd.f32 %v1015_v23, %v1007_v24  ;;  %v1035_v14 = vsel %vm466_vm2, %v1033_v10, %v1034_v17  ;;  %v1395_v10 = vld [vmem:[%s2484_s1] sm:$0xf] }
 0x1bc   : > { %1639 = vmatmul.msk.bf16.vlgmr.msra.gmra.mxu0 %vm1398_vm6, %v1395_v10  ;;  %1640 = vmatmul.msk.bf16.vlgmr.msra.gmra.mxu1 %vm1398_vm6, %v1395_v10  ;;  %vm1082_vm6 = vcmask 1014784  }
 0x1bd   : > { %v1027_v31 = vadd.f32 %v1025_v28, %v1017_v41 }
 0x1bf   : > { %v892_v11 = vpop.permute.xlu1 %891  ;;  %v2404_v16 = vpop.permute.xlu2 %1294  ;;  %v1037_v42 = vadd.f32 %v1035_v14, %v1027_v31 }
 0x1c0   : > { %v912_v12 = vpop.permute.xlu0 %911  ;;  %v893_v43 = vrot.slane %v892_v11, 1  ;;  %v1296_v41 = vrot.slane %v2404_v16, 1 }
 0x1c1   : > { %v913_v54 = vrot.slane %v912_v12, 1 }
 0x1c2   : > { %v894_v36 = vsel %vm466_vm2, %v892_v11, %v893_v43  ;;  %v1155_v11 = vrot.slane %v2398_v3, 1  ;;  %v1297_v17 = vsel %vm445_vm1, %v2404_v16, %v1296_v41 }
 0x1c3   : > { %v896_v49 = vadd.f32 %v894_v36, %v886_v26  ;;  %v914_v61 = vsel %vm487_vm3, %v912_v12, %v913_v54 }
 0x1c4   : > { %v1156_v7 = vsel %vm445_vm1, %v2398_v3, %v1155_v11 }
 0x1c5   : > { %v906_v59 = vadd.f32 %v904_v57, %v896_v49  ;;  %v1158_v27 = vadd.f32 %v1156_v7, %v2402_v45 }
 0x1c7   : > { %v2406_v13 = vpop.permute.xlu1 %1284  ;;  %v2410_v18 = vpop.permute.xlu2 %1173  ;;  %v916_v5 = vadd.f32 %v914_v61, %v906_v59 }
 0x1c8   : > { %v2408_v15 = vpop.permute.xlu0 %1304  ;;  %v1286_v12 = vrot.slane %v2406_v13, 1  ;;  %v1175_v35 = vrot.slane %v2410_v18, 1 }
 0x1c9   : > { %v1306_v3 = vrot.slane %v2408_v15, 1 }
 0x1ca   : > { %v1287_v23 = vsel %vm445_vm1, %v2406_v13, %v1286_v12  ;;  %v1176_v13 = vsel %vm466_vm2, %v2410_v18, %v1175_v35 }
 0x1cb   : > { %v1289_v43 = vadd.f32 %v1287_v23, %v2396_v33  ;;  %v1307_v33 = vsel %vm466_vm2, %v2408_v15, %v1306_v3 }
 0x1cd   : > { %v1299_v0 = vadd.f32 %v1297_v17, %v1289_v43 }
 0x1cf   : > { %v1164_v25 = vpop.permute.xlu1 %1163  ;;  %v1053_v30 = vpop.permute.xlu2 %1052 }
 0x1d0   : > { %v2414_v52 = vpop.permute.xlu0 %1183  ;;  %v1054_v4 = vrot.slane %v1053_v30, 1  ;;  %v1165_v20 = vrot.slane %v1164_v25, 1 }
 0x1d2   : > { %v1055_v1 = vsel %vm487_vm3, %v1053_v30, %v1054_v4  ;;  %v1166_v24 = vsel %vm466_vm2, %v1164_v25, %v1165_v20  ;;  %v1185_v25 = vrot.slane %v2414_v52, 1 }
 0x1d3   : > { %v1168_v30 = vadd.f32 %v1166_v24, %v1158_v27 }
 0x1d4   : > { %v1186_v40 = vsel %vm487_vm3, %v2414_v52, %v1185_v25 }
 0x1d5   : > { %v1178_v36 = vadd.f32 %v1176_v13, %v1168_v30 }
 0x1d7   : > { %v1043_v37 = vpop.permute.xlu1 %1042  ;;  %v932_v44 = vpop.permute.xlu2 %931  ;;  %v1188_v18 = vadd.f32 %v1186_v40, %v1178_v36 }
 0x1d8   : > { %v1044_v47 = vrot.slane %v1043_v37, 1  ;;  %v1063_v48 = vpop.permute.xlu0 %1062  ;;  %v933_v38 = vrot.slane %v932_v44, 1 }
 0x1d9   : > { %v1064_v19 = vrot.slane %v1063_v48, 1 }
 0x1da   : > { %v1045_v50 = vsel %vm487_vm3, %v1043_v37, %v1044_v47  ;;  %v934_v53 = vsel %vm508_vm4, %v932_v44, %v933_v38  ;;  %v1309_v47 = vadd.f32 %v1307_v33, %v1299_v0 }
 0x1db   : > { %v1047_v6 = vadd.f32 %v1045_v50, %v1037_v42  ;;  %v1065_v22 = vsel %vm508_vm4, %v1063_v48, %v1064_v19 }
 0x1dd   : > { %v1057_v29 = vadd.f32 %v1055_v1, %v1047_v6 }
 0x1df   : > { %v922_v63 = vpop.permute.xlu1 %921  ;;  %v1067_v32 = vadd.f32 %v1065_v22, %v1057_v29  ;;  %v1325_v21 = vpop.permute.xlu2 %1324 }
 0x1e0   : > { %v923_v62 = vrot.slane %v922_v63, 1  ;;  %v1073_v46 = vpop.permute.xlu0 %1072  ;;  %v1326_v42 = vrot.slane %v1325_v21, 1 }
 0x1e1   : > { %v1074_v55 = vrot.slane %v1073_v46, 1 }
 0x1e2   : > { %v924_v2 = vsel %vm508_vm4, %v922_v63, %v923_v62  ;;  %v1327_v15 = vsel %vm487_vm3, %v1325_v21, %v1326_v42 }
 0x1e3   : > { %v926_v56 = vadd.f32 %v924_v2, %v916_v5  ;;  %v1075_v58 = vsel %vm508_vm4, %v1073_v46, %v1074_v55  ;;  %v379_v2 = vld [vmem:[%s2485_s2] sm:$0x3] }
 0x1e4   : > { %v1077_v8 = vadd.f32 %v1075_v58, %v1067_v32  ;;  %v380_v58 = vadd.s32 4294967293, %v379_v2  ;;  %vm806_vm1 = vcmp.ge.s32.totalorder %v379_v2, 0  ;;  %v946_v27 = vadd.s32 1, %v379_v2 }
 0x1e5   : > { %v936_v34 = vadd.f32 %v934_v53, %v926_v56  ;;  %v524_v56 = vadd.s32 4294967294, %v379_v2  ;;  %v1087_v17 = vadd.s32 2, %v379_v2 }
 0x1e6   : > { %1079 = vrot.lane.b32.xlu1 %v1077_v8, %s1770_s7  ;;  %v665_v8 = vadd.s32 4294967295, %v379_v2  ;;  %vm381_vm10 = vcmp.ge.s32.totalorder %v380_v58, 0  ;;  %vm382_vm11 = vcmp.lt.s32.totalorder %v380_v58, 16 }
 0x1e7   : > { %v1315_v9 = vpop.permute.xlu1 %1314  ;;  %938 = vrot.lane.b32.xlu0 %v936_v34, %s1771_s14  ;;  %v1335_v26 = vpop.permute.xlu2 %1334  ;;  %vm525_vm7 = vcmp.ge.s32.totalorder %v524_v56, 0  ;;  %vm526_vm8 = vcmp.lt.s32.totalorder %v524_v56, 16  ;;  %vm383_vm0 = vmand %vm381_vm10, %vm382_vm11  ;;  %vm1088_vm10 = vcmp.ge.s32.totalorder %v1087_v17, 0  ;;  %vm1089_vm11 = vcmp.lt.s32.totalorder %v1087_v17, 16 }
 0x1e8   : > { %v1316_v31 = vrot.slane %v1315_v9, 1  ;;  %v1214_v37 = vpop.permute.xlu0 %1213  ;;  %v1336_v59 = vrot.slane %v1335_v26, 1  ;;  %vm2463_vm12 = vmand %vm525_vm7, %vm526_vm8  ;;  %vm666_vm13 = vcmp.ge.s32.totalorder %v665_v8, 0  ;;  %vm667_vm14 = vcmp.lt.s32.totalorder %v665_v8, 16 }
 0x1e9   : > { %v1215_v49 = vrot.slane %v1214_v37, 1  ;;  %v522_v24 = vsel %vm383_vm0, %v2247_v60, 0.0  ;;  %vm947_vm7 = vcmp.ge.s32.totalorder %v946_v27, 0  ;;  %vm948_vm8 = vcmp.lt.s32.totalorder %v946_v27, 16 }
 0x1ea   : > { %v1317_v16 = vsel %vm466_vm2, %v1315_v9, %v1316_v31  ;;  %v1337_v63 = vsel %vm487_vm3, %v1335_v26, %v1336_v59  ;;  %vm807_vm2 = vcmp.lt.s32.totalorder %v379_v2, 16  ;;  %v1228_v31 = vadd.s32 3, %v379_v2 }
 0x1eb   : > { %v1319_v50 = vadd.f32 %v1317_v16, %v1309_v47  ;;  %v1216_v52 = vsel %vm508_vm4, %v1214_v37, %v1215_v49  ;;  %vm808_vm5 = vmand %vm806_vm1, %vm807_vm2  ;;  %vm1364_vm0 = vcmask 998400  }
 0x1ed   : > { %v1329_v1 = vadd.f32 %v1327_v15, %v1319_v50 }
 0x1ef   : > { %v1194_v28 = vpop.permute.xlu1 %1193  ;;  %v1355_v44 = vpop.permute.xlu2 %1354  ;;  %v1339_v62 = vadd.f32 %v1337_v63, %v1329_v1 }
 0x1f0   : > { %v1195_v45 = vrot.slane %v1194_v28, 1  ;;  %v1356_v61 = vrot.slane %v1355_v44, 1 }
 0x1f2   : > { %v1196_v14 = vsel %vm487_vm3, %v1194_v28, %v1195_v45  ;;  %v1357_v22 = vsel %vm508_vm4, %v1355_v44, %v1356_v61  ;;  %vm941_vm3 = vcmask 1022976  }
 0x1f3   : > { %v1198_v6 = vadd.f32 %v1196_v14, %v1188_v18 }
 0x1f5   : > { %v658_v32 = vpop.permute.xlu0 %657 }
 0x1f6   : > { %v659_v53 = vrot.slane %v658_v32, 1 }
 0x1f7   : > { %v1204_v48 = vpop.permute.xlu1 %1203  ;;  %v799_v34 = vpop.permute.xlu2 %798 }
 0x1f8   : > { %v1205_v4 = vrot.slane %v1204_v48, 1  ;;  %v661_v11 = vsel %vm660_vm9, %v658_v32, %v659_v53  ;;  %v800_v12 = vrot.slane %v799_v34, 1  ;;  %vm949_vm9 = vmand %vm947_vm7, %vm948_vm8 }
 0x1f9   : > { %v663_v21 = vsel %vm2463_vm12, %v661_v11, 0.0  ;;  %vm1223_vm12 = vcmask 1006592  }
 0x1fa   : > { %v1206_v57 = vsel %vm508_vm4, %v1204_v48, %v1205_v4  ;;  %v802_v23 = vsel %vm801_vm15, %v799_v34, %v800_v12  ;;  %v664_v35 = vadd.f32 %v663_v21, %v522_v24  ;;  %vm1090_vm15 = vmand %vm1088_vm10, %vm1089_vm11 }
 0x1fb   : > { %v1208_v54 = vadd.f32 %v1206_v57, %v1198_v6 }
 0x1fd   : > { %v1218_v19 = vadd.f32 %v1216_v52, %v1208_v54 }
 0x1ff   : > { %v1345_v29 = vpop.permute.xlu1 %1344  ;;  %1220 = vrot.lane.b32.xlu2 %v1218_v19, %s1772_s9 }
 0x200   : > { %v1346_v38 = vrot.slane %v1345_v29, 1 }
 0x202   : > { %v1347_v46 = vsel %vm508_vm4, %v1345_v29, %v1346_v38  ;;  %vm2469_vm4 = vmand %vm666_vm13, %vm667_vm14  ;;  %vm1229_vm13 = vcmp.ge.s32.totalorder %v1228_v31, 0  ;;  %vm1230_vm14 = vcmp.lt.s32.totalorder %v1228_v31, 16 }
 0x203   : > { %v1349_v5 = vadd.f32 %v1347_v46, %v1339_v62  ;;  %v804_v30 = vsel %vm2469_vm4, %v802_v23, 0.0  ;;  %vm1231_vm1 = vmand %vm1229_vm13, %vm1230_vm14 }
 0x204   : > { %v805_v25 = vadd.f32 %v804_v30, %v664_v35 }
 0x205   : > { %v1359_v55 = vadd.f32 %v1357_v22, %v1349_v5 }
 0x207   : > { %1361 = vrot.lane.b32.xlu0 %v1359_v55, %s1773_s12 }
 0x239   : > { %v1418_v14 = vpop.f32.mrf.mxu0  ;;  %v1431_v4 = vpop.f32.mrf.mxu1 }
 0x241   : > { %v1420_v50 = vpop.f32.mrf.mxu0  ;;  %v1433_v54 = vpop.f32.mrf.mxu1 }
 0x258   : > { %v1080_v41 = vpop.permute.xlu1 %1079 }
 0x259   : > { %v939_v9 = vpop.permute.xlu0 %938  ;;  %v1081_v28 = vrot.slane %v1080_v41, 1  ;;  %v1221_v3 = vpop.permute.xlu2 %1220 }
 0x25a   : > { %v940_v20 = vrot.slane %v939_v9, 1  ;;  %v1222_v60 = vrot.slane %v1221_v3, 1 }
 0x25b   : > { %v1083_v45 = vsel %vm1082_vm6, %v1080_v41, %v1081_v28 }
 0x25c   : > { %v942_v43 = vsel %vm941_vm3, %v939_v9, %v940_v20  ;;  %v1085_v36 = vsel %vm949_vm9, %v1083_v45, 0.0  ;;  %v1224_v26 = vsel %vm1223_vm12, %v1221_v3, %v1222_v60 }
 0x25d   : > { %v944_v13 = vsel %vm808_vm5, %v942_v43, 0.0  ;;  %v1226_v16 = vsel %vm1090_vm15, %v1224_v26, 0.0 }
 0x25e   : > { %v945_v0 = vadd.f32 %v944_v13, %v805_v25 }
 0x260   : > { %v1086_v37 = vadd.f32 %v1085_v36, %v945_v0 }
 0x262   : > { %v1227_v47 = vadd.f32 %v1226_v16, %v1086_v37 }
 0x279   : > { %v1362_v33 = vpop.permute.xlu0 %1361 }
 0x27a   : > { %v1363_v40 = vrot.slane %v1362_v33, 1 }
 0x27c   : > { %v1365_v18 = vsel %vm1364_vm0, %v1362_v33, %v1363_v40 }
 0x27d   : > { %v1367_v48 = vsel %vm1231_vm1, %v1365_v18, 0.0 }
 0x27e   : > { %v1368_v42 = vadd.f32 %v1367_v48, %v1227_v47 }
 0x280   : > { %v1638_v49 = vmul.f32 -1.442695, %v1368_v42 }
 0x282   : > { %1701 = vpow2.f32 %v1638_v49 }
 0x288   : > { %v1702_v6 = vpop.eup %1701 }
 0x289   : > { %v1372_v57 = vadd.f32 1.0, %v1702_v6 }
 0x28b   : > { %1703 = vrcp.f32 %v1372_v57  ;;  %v1384_v1 = vand.u32 2147483648, %v1372_v57  ;;  %v1382_v19 = vand.u32 2147483647, %v1372_v57  ;;  %vm1378_vm3 = vweird.f32 %v1372_v57 }
 0x28d   : > { %v1385_v63 = vor.u32 1.1754944e-38, %v1384_v1  ;;  %vm1383_vm5 = vcmp.eq.f32.partialorder %v1382_v19, 8.507059e+37 }
 0x291   : > { %v1704_v15 = vpop.eup %1703 }
 0x292   : > { %v1374_v59 = vmul.f32 %v1704_v15, %v1372_v57  ;;  %vm1379_vm2 = vweird.f32 %v1704_v15 }
 0x293   : > { %vm1380_vm4 = vmor %vm1378_vm3, %vm1379_vm2 }
 0x294   : > { %v1375_v52 = vsub.f32 1.0, %v1374_v59 }
 0x296   : > { %v1376_v44 = vmul.f32 %v1704_v15, %v1375_v52 }
 0x298   : > { %v1377_v29 = vadd.f32 %v1704_v15, %v1376_v44 }
 0x29a   : > { %v1381_v61 = vsel %vm1380_vm4, %v1704_v15, %v1377_v29 }
 0x29b   : > { %v1386_v38 = vsel %vm1383_vm5, %v1385_v63, %v1381_v61 }
 0x29c   : > { %v1435_v62 = vadd.f32 1.0, %v1386_v38 }
 0x29e   : > { %v1437_v46 = vperm.slane %v1435_v62, 0  ;;  %v1438_v5 = vperm.slane %v1435_v62, 1 }
 0x2a0   : > { %v1441_v22 = vmul.f32 %v2385_v39, %v1437_v46  ;;  %v1442_v55 = vmul.f32 %v2389_v51, %v1438_v5 }
 0x2a2   : > { %v1443_v32 = vadd.f32 %v1441_v22, %v1418_v14  ;;  %v1444_v2 = vadd.f32 %v1442_v55, %v1431_v4 }
 0x2a4   : > { %1445 = vst [vmem:[%s1831_s10] sm:$0xff] %v1443_v32 }
 0x2a5   : > { %1446 = vst [vmem:[%s1831_s10 + $0x8] sm:$0xff] %v1444_v2 }
 0x2a6 PF: > { %s17_s18 = sadd.s32 1, %s1753_s18  }
 0x2a7   : > { %p14_p8 = scmp.ge.s32.totalorder %s17_s18, 4  }
 0x2a9   :  { %16 = sbr.rel (!%p14_p8) target bundleno = 2 (0x2), region = 84 }
 0x2ae   :  { %1468 = vsyncpa [#allocation5], 1 }
 0x2af   :  { %1470 = vsyncpa [#allocation5 + $0x1], 1 }
 0x2b0   :  { %1471 = vsyncpa [#allocation7], 1 }

</bundles_post_ra>
